<compile_context>
chip_gen: v7x
topology: tpu7x:2x2x1
jax: 0.10.0
libtpu: 0.0.40
codegen_flags: <defaults>
</compile_context>

<pallas_src>
import numpy as np
import jax
import jax.numpy as jnp
from jax.experimental import pallas as pl
from jax.experimental.pallas import tpu as pltpu

NEG_SLOPE = 0.01        # torch.nn.LeakyReLU default
BN_EPS = 1e-5           # torch BatchNorm default
CM = 16                 # channel_mult
OCC_HW = 10             # occ grid spatial size (occ_grid_dim = [1, 10, 10])
FEAT = 4 * CM * 2 * 2   # 256 = flat_fts
STATE_DIM = 8           # model_8d
H_DIM = 512


def _round_up(x, m):
    return ((x + m - 1) // m) * m


def _leaky(x):
    return jnp.where(x > 0, x, NEG_SLOPE * x)


# ----------------------------------------------------------------------------
# Kernel
# ----------------------------------------------------------------------------
def colchecker_kernel(occ_ref, start_ref, samp_ref,
                      wc1_ref, bc1_ref, wc2_ref, bc2_ref, wc3_ref, bc3_ref,
                      w1f_ref, w1s_ref, w1p_ref, bl_ref,
                      wh1_ref, bh1_ref, wh2_ref, bh2_ref,
                      out_ref):
    f32 = jnp.float32
    bf16 = jnp.bfloat16
    TB, NS, SD = samp_ref.shape

    def mxu(a, w_ref):
        # bf16 operands on the MXU, f32 accumulation.
        return jnp.dot(a.astype(bf16), w_ref[...], preferred_element_type=f32)

    # --- CNN encoder: each conv(+folded BN)+LeakyReLU layer is ONE matmul
    #     on 128-aligned, zero-padded dense slabs.
    h = _leaky(mxu(occ_ref[...], wc1_ref) + bc1_ref[...])        # (TB, 512)
    h = _leaky(mxu(h, wc2_ref) + bc2_ref[...])                   # (TB, 384)
    f = _leaky(mxu(h, wc3_ref) + bc3_ref[...])                   # (TB, 256), CHW order

    # --- layers: Linear(2*SD+256, 512)+BN1d(+folded)+LeakyReLU, split over the
    #     (f | start | samples) columns so the per-env repeat is implicit.
    env = mxu(f, w1f_ref) + mxu(start_ref[...], w1s_ref) + bl_ref[...]   # (TB, 512)

    # --- head: all NS samples stacked along M -> a single pass through wh1.
    H = w1p_ref.shape[1]
    samp2 = samp_ref[...].reshape(TB * NS, SD)                   # layout no-op (NS==8)
    proj = mxu(samp2, w1p_ref).reshape(TB, NS, H)                # (TB, NS, 512)
    x = _leaky(env[:, None, :] + proj).reshape(TB * NS, H)       # (TB*NS, 512)
    hh = _leaky(mxu(x, wh1_ref) + bh1_ref[...])                  # (TB*NS, 256)

    # Final Linear(256,1): 1-wide output done as VPU mul + lane reduce,
    # producing (TB, NS) directly (no N=1 matmul, no minor-dim reshape).
    hh3 = hh.reshape(TB, NS, hh.shape[1])                        # (TB, NS, 256)
    logits = jnp.sum(hh3 * wh2_ref[...][None, :, :], axis=-1) + bh2_ref[...]
    out_ref[...] = jax.nn.sigmoid(logits)                        # (TB, NS)


# ----------------------------------------------------------------------------
# Wrapper
# ----------------------------------------------------------------------------
def col_checker_small_forward(occ_grid, start, samples, params):
    """occ_grid: (B,1,10,10)  start: (B,SD)  samples: (B,NS,SD) -> (B,NS)."""
    B = occ_grid.shape[0]
    NS = samples.shape[1]
    SD = start.shape[1]

    occ_in = params[0].shape[0]                                   # 128 (padded K of conv1)
    occ_flat = occ_grid.reshape(B, -1).astype(jnp.float32)        # (B, 100)
    occ_flat = jnp.pad(occ_flat, ((0, 0), (0, occ_in - occ_flat.shape[1])))
    start = start.astype(jnp.float32)
    samples = samples.astype(jnp.float32)

    # Batch tiling: big tiles to amortize per-step overhead; guarantee >=2 grid
    # steps when the batch allows it so "parallel" shards across v7x's 2 TCs.
    TB = min(256, _round_up(B, 8))
    B_pad = _round_up(B, TB)
    if B_pad // TB < 2 and B > 8:
        TB = _round_up((B + 1) // 2, 8)
        B_pad = _round_up(B, TB)

    if B_pad != B:
        pad = B_pad - B
        occ_flat = jnp.pad(occ_flat, ((0, pad), (0, 0)))
        start = jnp.pad(start, ((0, pad), (0, 0)))
        samples = jnp.pad(samples, ((0, pad), (0, 0), (0, 0)))

    (wc1, bc1, wc2, bc2, wc3, bc3,
     w1f, w1s, w1p, bl, wh1, bh1, wh2, bh2) = params

    def const_spec(a):
        return pl.BlockSpec(a.shape, lambda i, _nd=a.ndim: (0,) * _nd)

    out = pl.pallas_call(
        colchecker_kernel,
        out_shape=jax.ShapeDtypeStruct((B_pad, NS), jnp.float32),
        grid=(B_pad // TB,),
        in_specs=[
            pl.BlockSpec((TB, occ_in), lambda i: (i, 0)),
            pl.BlockSpec((TB, SD), lambda i: (i, 0)),
            pl.BlockSpec((TB, NS, SD), lambda i: (i, 0, 0)),
            const_spec(wc1), const_spec(bc1),
            const_spec(wc2), const_spec(bc2),
            const_spec(wc3), const_spec(bc3),
            const_spec(w1f), const_spec(w1s), const_spec(w1p), const_spec(bl),
            const_spec(wh1), const_spec(bh1), const_spec(wh2), const_spec(bh2),
        ],
        out_specs=pl.BlockSpec((TB, NS), lambda i: (i, 0)),
        compiler_params=pltpu.CompilerParams(
            dimension_semantics=("parallel",)),
    )(occ_flat, start, samples,
      wc1, bc1, wc2, bc2, wc3, bc3,
      w1f, w1s, w1p, bl, wh1, bh1, wh2, bh2)

    return out[:B]


# ----------------------------------------------------------------------------
# Parameter construction (host-side, once): scatter conv taps + padding +
# folded BN into dense 128-aligned (Din, Dout) matrices; split/fold the MLP.
# ----------------------------------------------------------------------------
def _dense_conv_matrix(w, b, *, h_in, h_out, K, S, P, cin):
    """w: (Cout, Cin, K, K) torch layout -> dense (h_in^2*Cin, h_out^2*Cout),
    rows/cols in (h, w, c) flatten order; zero padding handled by omission."""
    cout = w.shape[0]
    Wb = np.zeros((h_in * h_in * cin, h_out * h_out * cout), np.float32)
    for oh in range(h_out):
        for ow in range(h_out):
            c0 = (oh * h_out + ow) * cout
            for kh in range(K):
                for kw in range(K):
                    ih = S * oh + kh - P
                    iw = S * ow + kw - P
                    if 0 <= ih < h_in and 0 <= iw < h_in:
                        r0 = (ih * h_in + iw) * cin
                        Wb[r0:r0 + cin, c0:c0 + cout] = w[:, :, kh, kw].T
    bb = np.tile(np.asarray(b, np.float32), h_out * h_out)
    return Wb, bb


def _pad2(a, rows, cols):
    return np.pad(a, ((0, rows - a.shape[0]), (0, cols - a.shape[1])))


def init_params(key, state_dim=STATE_DIM, h_dim=H_DIM):
    ks = list(jax.random.split(key, 32))
    it = iter(ks)

    def unif(shape, fan_in):
        bound = 1.0 / np.sqrt(fan_in)
        return np.asarray(
            jax.random.uniform(next(it), shape, jnp.float32, -bound, bound))

    def bn_stats(n):
        g = np.asarray(jax.random.uniform(next(it), (n,), jnp.float32, 0.5, 1.5))
        beta = np.asarray(0.1 * jax.random.normal(next(it), (n,), jnp.float32))
        mean = np.asarray(0.1 * jax.random.normal(next(it), (n,), jnp.float32))
        var = np.asarray(jax.random.uniform(next(it), (n,), jnp.float32, 0.5, 1.5))
        return g, beta, mean, var

    # ---- conv stack (torch shapes) ----
    w1 = unif((CM, 1, 4, 4), 1 * 16);           b1 = unif((CM,), 1 * 16)
    w2 = unif((2 * CM, CM, 3, 3), CM * 9);      b2 = unif((2 * CM,), CM * 9)
    w3 = unif((4 * CM, 2 * CM, 3, 3), 2 * CM * 9)
    b3 = unif((4 * CM,), 2 * CM * 9)

    g2, be2, m2, v2 = bn_stats(2 * CM)
    g3, be3, m3, v3 = bn_stats(4 * CM)

    def fold_conv_bn(w, b, g, beta, mean, var):
        s = g / np.sqrt(var + BN_EPS)
        return w * s[:, None, None, None], (b - mean) * s + beta

    w2f, b2f = fold_conv_bn(w2, b2, g2, be2, m2, v2)
    w3f, b3f = fold_conv_bn(w3, b3, g3, be3, m3, v3)

    wc1, bc1 = _dense_conv_matrix(w1, b1, h_in=10, h_out=5, K=4, S=2, P=1, cin=1)
    wc2, bc2 = _dense_conv_matrix(w2f, b2f, h_in=5, h_out=3, K=3, S=2, P=1, cin=CM)
    wc3, bc3 = _dense_conv_matrix(w3f, b3f, h_in=3, h_out=2, K=3, S=2, P=1, cin=2 * CM)

    # Reorder layer-3 output columns from (h,w,c) to PyTorch NCHW flatten (c,h,w).
    cout3, hw3 = 4 * CM, 2 * 2
    perm = np.array([(j % hw3) * cout3 + (j // hw3) for j in range(cout3 * hw3)])
    wc3 = wc3[:, perm]
    bc3 = bc3[perm]

    # ---- 128-align all conv K/N dims (zeros; padded activations stay 0) ----
    wc1 = _pad2(wc1, 128, 512);  bc1 = np.pad(bc1, (0, 512 - bc1.shape[0]))   # (128,512)
    wc2 = _pad2(wc2, 512, 384);  bc2 = np.pad(bc2, (0, 384 - bc2.shape[0]))   # (512,384)
    wc3 = _pad2(wc3, 384, 256)                                                # (384,256)

    # ---- layers: Linear(256 + 2*SD, 512) + BN1d (folded) ----
    d_in = FEAT + 2 * state_dim
    wl = unif((h_dim, d_in), d_in);             blb = unif((h_dim,), d_in)
    g1, be1, m1, v1 = bn_stats(h_dim)
    s1 = g1 / np.sqrt(v1 + BN_EPS)
    wl_eff = wl * s1[:, None]
    bl_eff = (blb - m1) * s1 + be1
    w1f = wl_eff[:, :FEAT].T                               # (256, 512)
    w1s = wl_eff[:, FEAT:FEAT + state_dim].T               # (SD, 512)
    w1p = wl_eff[:, FEAT + state_dim:].T                   # (SD, 512)

    # ---- head: Linear(512,256) -> LeakyReLU -> Linear(256,1) -> Sigmoid ----
    wh1 = unif((256, h_dim), h_dim);            bh1 = unif((256,), h_dim)
    wh2 = unif((1, 256), 256);                  bh2 = unif((1,), 256)

    def bf(a):
        return jnp.asarray(a, jnp.bfloat16)

    def f32(a):
        return jnp.asarray(a, jnp.float32)

    # MXU weights in bf16; biases / final row-vector weight stay f32 (VPU path).
    return (bf(wc1), f32(bc1[None, :]), bf(wc2), f32(bc2[None, :]),
            bf(wc3), f32(bc3[None, :]),
            bf(w1f), bf(w1s), bf(w1p), f32(bl_eff[None, :]),
            bf(wh1.T), f32(bh1[None, :]),
            f32(wh2), f32(bh2.reshape(1, 1)))


# ----------------------------------------------------------------------------
# Pure-JAX reference (same dense slabs, f32 matmuls) for a sanity check.
# ----------------------------------------------------------------------------
def _reference_forward(occ_flat_pad, start, samples, params):
    (wc1, bc1, wc2, bc2, wc3, bc3,
     w1f, w1s, w1p, bl, wh1, bh1, wh2, bh2) = params
    up = lambda a: a.astype(jnp.float32)
    h = _leaky(occ_flat_pad @ up(wc1) + bc1)
    h = _leaky(h @ up(wc2) + bc2)
    f = _leaky(h @ up(wc3) + bc3)
    B, NS, SD = samples.shape
    f_rep = jnp.repeat(f, NS, axis=0)
    s_rep = jnp.repeat(start, NS, axis=0)
    p = samples.reshape(B * NS, SD)
    x = _leaky(f_rep @ up(w1f) + s_rep @ up(w1s) + p @ up(w1p) + bl)
    hh = _leaky(x @ up(wh1) + bh1)
    y = hh @ up(wh2).T + bh2
    return jax.nn.sigmoid(y).reshape(B, NS)


# ----------------------------------------------------------------------------
if __name__ == "__main__":
    key = jax.random.PRNGKey(0)
    pkey, k1, k2, k3 = jax.random.split(key, 4)
    params = init_params(pkey)

    bs, ns, sd = 2, 8, STATE_DIM
    occ_grid = (jax.random.uniform(k1, (bs, 1, OCC_HW, OCC_HW), jnp.float32)
                > 0.5).astype(jnp.float32)
    start = jax.random.normal(k2, (bs, sd), jnp.float32)
    samples = jax.random.normal(k3, (bs, ns, sd), jnp.float32)

    y = col_checker_small_forward(occ_grid, start, samples, params)
    y = jax.block_until_ready(y)

    assert y.shape == (bs, ns), y.shape
    assert bool(jnp.all(jnp.isfinite(y)))
    assert bool(jnp.all((y >= 0.0) & (y <= 1.0)))

    # Cross-check against the pure-JAX reference (only bf16 activation casts
    # differ inside the kernel).
    occ_in = params[0].shape[0]
    occ_flat = occ_grid.reshape(bs, -1)
    occ_flat = jnp.pad(occ_flat, ((0, 0), (0, occ_in - occ_flat.shape[1])))
    y_ref = _reference_forward(occ_flat, start, samples, params)
    assert bool(jnp.max(jnp.abs(y - y_ref)) < 5e-2)

    print("KERNEL_OK")
</pallas_src>

<mosaic_0001>
module attributes {stable_mosaic.version = 11 : i64} {
  func.func @colchecker_kernel(%arg0: i32, %arg1: memref<8x128xf32, #tpu.memory_space<vmem>>, %arg2: memref<8x8xf32, #tpu.memory_space<vmem>>, %arg3: memref<8x8x8xf32, #tpu.memory_space<vmem>>, %arg4: memref<128x512xbf16, #tpu.memory_space<vmem>>, %arg5: memref<1x512xf32, #tpu.memory_space<vmem>>, %arg6: memref<512x384xbf16, #tpu.memory_space<vmem>>, %arg7: memref<1x384xf32, #tpu.memory_space<vmem>>, %arg8: memref<384x256xbf16, #tpu.memory_space<vmem>>, %arg9: memref<1x256xf32, #tpu.memory_space<vmem>>, %arg10: memref<256x512xbf16, #tpu.memory_space<vmem>>, %arg11: memref<8x512xbf16, #tpu.memory_space<vmem>>, %arg12: memref<8x512xbf16, #tpu.memory_space<vmem>>, %arg13: memref<1x512xf32, #tpu.memory_space<vmem>>, %arg14: memref<512x256xbf16, #tpu.memory_space<vmem>>, %arg15: memref<1x256xf32, #tpu.memory_space<vmem>>, %arg16: memref<1x256xf32, #tpu.memory_space<vmem>>, %arg17: memref<1x1xf32, #tpu.memory_space<vmem>>, %arg18: memref<8x8xf32, #tpu.memory_space<vmem>>) attributes {dimension_semantics = [#tpu.dimension_semantics<parallel>], iteration_bounds = array<i64: 1>, scalar_prefetch = 0 : i64, scratch_operands = 0 : i64, tpu.core_type = #tpu.core_type<tc>, window_params = [{transform_indices = @transform_0, window_bounds = array<i64: 8, 128>}, {transform_indices = @transform_1, window_bounds = array<i64: 8, 8>}, {transform_indices = @transform_2, window_bounds = array<i64: 8, 8, 8>}, {pipeline_mode = #tpu.pipeline_mode<synchronous>, transform_indices = @transform_3, window_bounds = array<i64: 128, 512>}, {pipeline_mode = #tpu.pipeline_mode<synchronous>, transform_indices = @transform_4, window_bounds = array<i64: 1, 512>}, {pipeline_mode = #tpu.pipeline_mode<synchronous>, transform_indices = @transform_5, window_bounds = array<i64: 512, 384>}, {pipeline_mode = #tpu.pipeline_mode<synchronous>, transform_indices = @transform_6, window_bounds = array<i64: 1, 384>}, {pipeline_mode = #tpu.pipeline_mode<synchronous>, transform_indices = @transform_7, window_bounds = array<i64: 384, 256>}, {pipeline_mode = #tpu.pipeline_mode<synchronous>, transform_indices = @transform_8, window_bounds = array<i64: 1, 256>}, {pipeline_mode = #tpu.pipeline_mode<synchronous>, transform_indices = @transform_9, window_bounds = array<i64: 256, 512>}, {pipeline_mode = #tpu.pipeline_mode<synchronous>, transform_indices = @transform_10, window_bounds = array<i64: 8, 512>}, {pipeline_mode = #tpu.pipeline_mode<synchronous>, transform_indices = @transform_11, window_bounds = array<i64: 8, 512>}, {pipeline_mode = #tpu.pipeline_mode<synchronous>, transform_indices = @transform_12, window_bounds = array<i64: 1, 512>}, {pipeline_mode = #tpu.pipeline_mode<synchronous>, transform_indices = @transform_13, window_bounds = array<i64: 512, 256>}, {pipeline_mode = #tpu.pipeline_mode<synchronous>, transform_indices = @transform_14, window_bounds = array<i64: 1, 256>}, {pipeline_mode = #tpu.pipeline_mode<synchronous>, transform_indices = @transform_15, window_bounds = array<i64: 1, 256>}, {pipeline_mode = #tpu.pipeline_mode<synchronous>, transform_indices = @transform_16, window_bounds = array<i64: 1, 1>}, {transform_indices = @transform_17, window_bounds = array<i64: 8, 8>}]} {
    %c0 = arith.constant 0 : index
    %c0_0 = arith.constant 0 : index
    %0 = vector.load %arg1[%c0, %c0_0] : memref<8x128xf32, #tpu.memory_space<vmem>>, vector<8x128xf32>
    %1 = arith.truncf %0 : vector<8x128xf32> to vector<8x128xbf16>
    %c0_1 = arith.constant 0 : index
    %c0_2 = arith.constant 0 : index
    %2 = vector.load %arg4[%c0_1, %c0_2] : memref<128x512xbf16, #tpu.memory_space<vmem>>, vector<128x512xbf16>
    %cst = arith.constant dense<0.000000e+00> : vector<8x512xf32>
    %3 = tpu.matmul %1, %2, %cst {dimension_numbers = #tpu.dot_dimension_numbers<[1], [0], [0], [1], [0, 0, 1, 1], [], []>} : vector<8x128xbf16>, vector<128x512xbf16>, vector<8x512xf32> -> vector<8x512xf32>
    %c0_3 = arith.constant 0 : index
    %c0_4 = arith.constant 0 : index
    %4 = vector.load %arg5[%c0_3, %c0_4] : memref<1x512xf32, #tpu.memory_space<vmem>>, vector<1x512xf32>
    %5 = vector.broadcast %4 : vector<1x512xf32> to vector<8x512xf32>
    %6 = arith.addf %3, %5 : vector<8x512xf32>
    %cst_5 = arith.constant 0.000000e+00 : f32
    %7 = vector.broadcast %cst_5 : f32 to vector<8x512xf32>
    %8 = arith.cmpf ogt, %6, %7 : vector<8x512xf32>
    %cst_6 = arith.constant 0.00999999977 : f32
    %9 = vector.broadcast %cst_6 : f32 to vector<8x512xf32>
    %10 = arith.mulf %9, %6 : vector<8x512xf32>
    %11 = arith.select %8, %6, %10 : vector<8x512xi1>, vector<8x512xf32>
    %12 = arith.truncf %11 : vector<8x512xf32> to vector<8x512xbf16>
    %c0_7 = arith.constant 0 : index
    %c0_8 = arith.constant 0 : index
    %13 = vector.load %arg6[%c0_7, %c0_8] : memref<512x384xbf16, #tpu.memory_space<vmem>>, vector<512x384xbf16>
    %cst_9 = arith.constant dense<0.000000e+00> : vector<8x384xf32>
    %14 = tpu.matmul %12, %13, %cst_9 {dimension_numbers = #tpu.dot_dimension_numbers<[1], [0], [0], [1], [0, 0, 1, 1], [], []>} : vector<8x512xbf16>, vector<512x384xbf16>, vector<8x384xf32> -> vector<8x384xf32>
    %c0_10 = arith.constant 0 : index
    %c0_11 = arith.constant 0 : index
    %15 = vector.load %arg7[%c0_10, %c0_11] : memref<1x384xf32, #tpu.memory_space<vmem>>, vector<1x384xf32>
    %16 = vector.broadcast %15 : vector<1x384xf32> to vector<8x384xf32>
    %17 = arith.addf %14, %16 : vector<8x384xf32>
    %cst_12 = arith.constant 0.000000e+00 : f32
    %18 = vector.broadcast %cst_12 : f32 to vector<8x384xf32>
    %19 = arith.cmpf ogt, %17, %18 : vector<8x384xf32>
    %cst_13 = arith.constant 0.00999999977 : f32
    %20 = vector.broadcast %cst_13 : f32 to vector<8x384xf32>
    %21 = arith.mulf %20, %17 : vector<8x384xf32>
    %22 = arith.select %19, %17, %21 : vector<8x384xi1>, vector<8x384xf32>
    %23 = arith.truncf %22 : vector<8x384xf32> to vector<8x384xbf16>
    %c0_14 = arith.constant 0 : index
    %c0_15 = arith.constant 0 : index
    %24 = vector.load %arg8[%c0_14, %c0_15] : memref<384x256xbf16, #tpu.memory_space<vmem>>, vector<384x256xbf16>
    %cst_16 = arith.constant dense<0.000000e+00> : vector<8x256xf32>
    %25 = tpu.matmul %23, %24, %cst_16 {dimension_numbers = #tpu.dot_dimension_numbers<[1], [0], [0], [1], [0, 0, 1, 1], [], []>} : vector<8x384xbf16>, vector<384x256xbf16>, vector<8x256xf32> -> vector<8x256xf32>
    %c0_17 = arith.constant 0 : index
    %c0_18 = arith.constant 0 : index
    %26 = vector.load %arg9[%c0_17, %c0_18] : memref<1x256xf32, #tpu.memory_space<vmem>>, vector<1x256xf32>
    %27 = vector.broadcast %26 : vector<1x256xf32> to vector<8x256xf32>
    %28 = arith.addf %25, %27 : vector<8x256xf32>
    %cst_19 = arith.constant 0.000000e+00 : f32
    %29 = vector.broadcast %cst_19 : f32 to vector<8x256xf32>
    %30 = arith.cmpf ogt, %28, %29 : vector<8x256xf32>
    %cst_20 = arith.constant 0.00999999977 : f32
    %31 = vector.broadcast %cst_20 : f32 to vector<8x256xf32>
    %32 = arith.mulf %31, %28 : vector<8x256xf32>
    %33 = arith.select %30, %28, %32 : vector<8x256xi1>, vector<8x256xf32>
    %34 = arith.truncf %33 : vector<8x256xf32> to vector<8x256xbf16>
    %c0_21 = arith.constant 0 : index
    %c0_22 = arith.constant 0 : index
    %35 = vector.load %arg10[%c0_21, %c0_22] : memref<256x512xbf16, #tpu.memory_space<vmem>>, vector<256x512xbf16>
    %cst_23 = arith.constant dense<0.000000e+00> : vector<8x512xf32>
    %36 = tpu.matmul %34, %35, %cst_23 {dimension_numbers = #tpu.dot_dimension_numbers<[1], [0], [0], [1], [0, 0, 1, 1], [], []>} : vector<8x256xbf16>, vector<256x512xbf16>, vector<8x512xf32> -> vector<8x512xf32>
    %c0_24 = arith.constant 0 : index
    %c0_25 = arith.constant 0 : index
    %37 = vector.load %arg2[%c0_24, %c0_25] : memref<8x8xf32, #tpu.memory_space<vmem>>, vector<8x8xf32>
    %38 = arith.truncf %37 : vector<8x8xf32> to vector<8x8xbf16>
    %c0_26 = arith.constant 0 : index
    %c0_27 = arith.constant 0 : index
    %39 = vector.load %arg11[%c0_26, %c0_27] : memref<8x512xbf16, #tpu.memory_space<vmem>>, vector<8x512xbf16>
    %cst_28 = arith.constant dense<0.000000e+00> : vector<8x512xf32>
    %40 = tpu.matmul %38, %39, %cst_28 {dimension_numbers = #tpu.dot_dimension_numbers<[1], [0], [0], [1], [0, 0, 1, 1], [], []>} : vector<8x8xbf16>, vector<8x512xbf16>, vector<8x512xf32> -> vector<8x512xf32>
    %41 = arith.addf %36, %40 : vector<8x512xf32>
    %c0_29 = arith.constant 0 : index
    %c0_30 = arith.constant 0 : index
    %42 = vector.load %arg13[%c0_29, %c0_30] : memref<1x512xf32, #tpu.memory_space<vmem>>, vector<1x512xf32>
    %43 = vector.broadcast %42 : vector<1x512xf32> to vector<8x512xf32>
    %44 = arith.addf %41, %43 : vector<8x512xf32>
    %c0_31 = arith.constant 0 : index
    %c0_32 = arith.constant 0 : index
    %c0_33 = arith.constant 0 : index
    %45 = vector.load %arg3[%c0_31, %c0_32, %c0_33] : memref<8x8x8xf32, #tpu.memory_space<vmem>>, vector<8x8x8xf32>
    %46 = vector.shape_cast %45 : vector<8x8x8xf32> to vector<64x8xf32>
    %47 = arith.truncf %46 : vector<64x8xf32> to vector<64x8xbf16>
    %c0_34 = arith.constant 0 : index
    %c0_35 = arith.constant 0 : index
    %48 = vector.load %arg12[%c0_34, %c0_35] : memref<8x512xbf16, #tpu.memory_space<vmem>>, vector<8x512xbf16>
    %cst_36 = arith.constant dense<0.000000e+00> : vector<64x512xf32>
    %49 = tpu.matmul %47, %48, %cst_36 {dimension_numbers = #tpu.dot_dimension_numbers<[1], [0], [0], [1], [0, 0, 1, 1], [], []>} : vector<64x8xbf16>, vector<8x512xbf16>, vector<64x512xf32> -> vector<64x512xf32>
    %50 = vector.shape_cast %49 : vector<64x512xf32> to vector<8x8x512xf32>
    %51 = vector.shape_cast %44 : vector<8x512xf32> to vector<8x1x512xf32>
    %52 = vector.broadcast %51 : vector<8x1x512xf32> to vector<8x8x512xf32>
    %53 = arith.addf %52, %50 : vector<8x8x512xf32>
    %cst_37 = arith.constant 0.000000e+00 : f32
    %54 = vector.broadcast %cst_37 : f32 to vector<8x8x512xf32>
    %55 = arith.cmpf ogt, %53, %54 : vector<8x8x512xf32>
    %cst_38 = arith.constant 0.00999999977 : f32
    %56 = vector.broadcast %cst_38 : f32 to vector<8x8x512xf32>
    %57 = arith.mulf %56, %53 : vector<8x8x512xf32>
    %58 = arith.select %55, %53, %57 : vector<8x8x512xi1>, vector<8x8x512xf32>
    %59 = vector.shape_cast %58 : vector<8x8x512xf32> to vector<64x512xf32>
    %60 = arith.truncf %59 : vector<64x512xf32> to vector<64x512xbf16>
    %c0_39 = arith.constant 0 : index
    %c0_40 = arith.constant 0 : index
    %61 = vector.load %arg14[%c0_39, %c0_40] : memref<512x256xbf16, #tpu.memory_space<vmem>>, vector<512x256xbf16>
    %cst_41 = arith.constant dense<0.000000e+00> : vector<64x256xf32>
    %62 = tpu.matmul %60, %61, %cst_41 {dimension_numbers = #tpu.dot_dimension_numbers<[1], [0], [0], [1], [0, 0, 1, 1], [], []>} : vector<64x512xbf16>, vector<512x256xbf16>, vector<64x256xf32> -> vector<64x256xf32>
    %c0_42 = arith.constant 0 : index
    %c0_43 = arith.constant 0 : index
    %63 = vector.load %arg15[%c0_42, %c0_43] : memref<1x256xf32, #tpu.memory_space<vmem>>, vector<1x256xf32>
    %64 = vector.broadcast %63 : vector<1x256xf32> to vector<64x256xf32>
    %65 = arith.addf %62, %64 : vector<64x256xf32>
    %cst_44 = arith.constant 0.000000e+00 : f32
    %66 = vector.broadcast %cst_44 : f32 to vector<64x256xf32>
    %67 = arith.cmpf ogt, %65, %66 : vector<64x256xf32>
    %cst_45 = arith.constant 0.00999999977 : f32
    %68 = vector.broadcast %cst_45 : f32 to vector<64x256xf32>
    %69 = arith.mulf %68, %65 : vector<64x256xf32>
    %70 = arith.select %67, %65, %69 : vector<64x256xi1>, vector<64x256xf32>
    %71 = vector.shape_cast %70 : vector<64x256xf32> to vector<8x8x256xf32>
    %c0_46 = arith.constant 0 : index
    %c0_47 = arith.constant 0 : index
    %72 = vector.load %arg16[%c0_46, %c0_47] : memref<1x256xf32, #tpu.memory_space<vmem>>, vector<1x256xf32>
    %73 = vector.shape_cast %72 : vector<1x256xf32> to vector<1x1x256xf32>
    %74 = vector.broadcast %73 : vector<1x1x256xf32> to vector<8x8x256xf32>
    %75 = arith.mulf %71, %74 : vector<8x8x256xf32>
    %cst_48 = arith.constant dense<0.000000e+00> : vector<8x8xf32>
    %76 = vector.multi_reduction <add>, %75, %cst_48 [2] : vector<8x8x256xf32> to vector<8x8xf32>
    %c0_49 = arith.constant 0 : index
    %c0_50 = arith.constant 0 : index
    %77 = vector.load %arg17[%c0_49, %c0_50] : memref<1x1xf32, #tpu.memory_space<vmem>>, vector<1x1xf32>
    %78 = vector.broadcast %77 : vector<1x1xf32> to vector<8x8xf32>
    %79 = arith.addf %76, %78 : vector<8x8xf32>
    %80 = arith.negf %79 : vector<8x8xf32>
    %81 = math.exp %80 : vector<8x8xf32>
    %cst_51 = arith.constant 1.000000e+00 : f32
    %82 = vector.broadcast %cst_51 : f32 to vector<8x8xf32>
    %83 = arith.addf %82, %81 : vector<8x8xf32>
    %84 = arith.divf %82, %83 : vector<8x8xf32>
    %c0_52 = arith.constant 0 : index
    %c0_53 = arith.constant 0 : index
    %85 = vector.load %arg18[%c0_52, %c0_53] : memref<8x8xf32, #tpu.memory_space<vmem>>, vector<8x8xf32>
    tpu.vector_store %arg18[%c0_52, %c0_53], %84 {strides = array<i32>} : memref<8x8xf32, #tpu.memory_space<vmem>>, vector<8x8xf32>,
    return
  }
  func.func @transform_0(%arg0: i32) -> (i32, i32) {
    %c0_i32 = arith.constant 0 : i32
    %c0_i32_0 = arith.constant 0 : i32
    return %arg0, %c0_i32 : i32, i32
  }
  func.func @transform_1(%arg0: i32) -> (i32, i32) {
    %c0_i32 = arith.constant 0 : i32
    %c0_i32_0 = arith.constant 0 : i32
    return %arg0, %c0_i32 : i32, i32
  }
  func.func @transform_2(%arg0: i32) -> (i32, i32, i32) {
    %c0_i32 = arith.constant 0 : i32
    %c0_i32_0 = arith.constant 0 : i32
    %c0_i32_1 = arith.constant 0 : i32
    return %arg0, %c0_i32, %c0_i32_0 : i32, i32, i32
  }
  func.func @transform_3(%arg0: i32) -> (i32, i32) {
    %c0_i32 = arith.constant 0 : i32
    %c0_i32_0 = arith.constant 0 : i32
    %c0_i32_1 = arith.constant 0 : i32
    return %c0_i32, %c0_i32_0 : i32, i32
  }
  func.func @transform_4(%arg0: i32) -> (i32, i32) {
    %c0_i32 = arith.constant 0 : i32
    %c0_i32_0 = arith.constant 0 : i32
    %c0_i32_1 = arith.constant 0 : i32
    return %c0_i32, %c0_i32_0 : i32, i32
  }
  func.func @transform_5(%arg0: i32) -> (i32, i32) {
    %c0_i32 = arith.constant 0 : i32
    %c0_i32_0 = arith.constant 0 : i32
    %c0_i32_1 = arith.constant 0 : i32
    return %c0_i32, %c0_i32_0 : i32, i32
  }
  func.func @transform_6(%arg0: i32) -> (i32, i32) {
    %c0_i32 = arith.constant 0 : i32
    %c0_i32_0 = arith.constant 0 : i32
    %c0_i32_1 = arith.constant 0 : i32
    return %c0_i32, %c0_i32_0 : i32, i32
  }
  func.func @transform_7(%arg0: i32) -> (i32, i32) {
    %c0_i32 = arith.constant 0 : i32
    %c0_i32_0 = arith.constant 0 : i32
    %c0_i32_1 = arith.constant 0 : i32
    return %c0_i32, %c0_i32_0 : i32, i32
  }
  func.func @transform_8(%arg0: i32) -> (i32, i32) {
    %c0_i32 = arith.constant 0 : i32
    %c0_i32_0 = arith.constant 0 : i32
    %c0_i32_1 = arith.constant 0 : i32
    return %c0_i32, %c0_i32_0 : i32, i32
  }
  func.func @transform_9(%arg0: i32) -> (i32, i32) {
    %c0_i32 = arith.constant 0 : i32
    %c0_i32_0 = arith.constant 0 : i32
    %c0_i32_1 = arith.constant 0 : i32
    return %c0_i32, %c0_i32_0 : i32, i32
  }
  func.func @transform_10(%arg0: i32) -> (i32, i32) {
    %c0_i32 = arith.constant 0 : i32
    %c0_i32_0 = arith.constant 0 : i32
    %c0_i32_1 = arith.constant 0 : i32
    return %c0_i32, %c0_i32_0 : i32, i32
  }
  func.func @transform_11(%arg0: i32) -> (i32, i32) {
    %c0_i32 = arith.constant 0 : i32
    %c0_i32_0 = arith.constant 0 : i32
    %c0_i32_1 = arith.constant 0 : i32
    return %c0_i32, %c0_i32_0 : i32, i32
  }
  func.func @transform_12(%arg0: i32) -> (i32, i32) {
    %c0_i32 = arith.constant 0 : i32
    %c0_i32_0 = arith.constant 0 : i32
    %c0_i32_1 = arith.constant 0 : i32
    return %c0_i32, %c0_i32_0 : i32, i32
  }
  func.func @transform_13(%arg0: i32) -> (i32, i32) {
    %c0_i32 = arith.constant 0 : i32
    %c0_i32_0 = arith.constant 0 : i32
    %c0_i32_1 = arith.constant 0 : i32
    return %c0_i32, %c0_i32_0 : i32, i32
  }
  func.func @transform_14(%arg0: i32) -> (i32, i32) {
    %c0_i32 = arith.constant 0 : i32
    %c0_i32_0 = arith.constant 0 : i32
    %c0_i32_1 = arith.constant 0 : i32
    return %c0_i32, %c0_i32_0 : i32, i32
  }
  func.func @transform_15(%arg0: i32) -> (i32, i32) {
    %c0_i32 = arith.constant 0 : i32
    %c0_i32_0 = arith.constant 0 : i32
    %c0_i32_1 = arith.constant 0 : i32
    return %c0_i32, %c0_i32_0 : i32, i32
  }
  func.func @transform_16(%arg0: i32) -> (i32, i32) {
    %c0_i32 = arith.constant 0 : i32
    %c0_i32_0 = arith.constant 0 : i32
    %c0_i32_1 = arith.constant 0 : i32
    return %c0_i32, %c0_i32_0 : i32, i32
  }
  func.func @transform_17(%arg0: i32) -> (i32, i32) {
    %c0_i32 = arith.constant 0 : i32
    %c0_i32_0 = arith.constant 0 : i32
    return %arg0, %c0_i32 : i32, i32
  }
}

</mosaic_0001>

<bundles_post_ra>
// kernel: tpu_custom_call.1
= control target key start
LH: loop header
LB: loop body
LE: loop exit
PB: predicated region body
PF: predicated region fallthrough
CT: control target
= control target key end

     0   :  { %s5618_s0 = inlined_call_operand.hbm [shape: f32[8,128], index: 0, kind: input, shape index: {}]   ;;  %s5619_s1 = inlined_call_operand.hbm [shape: f32[8,8], index: 1, kind: input, shape index: {}]   ;;  %s5620_s2 = inlined_call_operand.hbm [shape: f32[8,8,8], index: 2, kind: input, shape index: {}]   ;;  %s5621_s3 = inlined_call_operand.hbm [shape: bf16[128,512], index: 3, kind: input, shape index: {}]   ;;  %s5622_s4 = inlined_call_operand.hbm [shape: f32[1,512], index: 4, kind: input, shape index: {}]   ;;  %s5623_s5 = inlined_call_operand.hbm [shape: bf16[512,384], index: 5, kind: input, shape index: {}]   ;;  %s5624_s6 = inlined_call_operand.hbm [shape: f32[1,384], index: 6, kind: input, shape index: {}]   ;;  %s5625_s7 = inlined_call_operand.hbm [shape: bf16[384,256], index: 7, kind: input, shape index: {}]   ;;  %s5626_s8 = inlined_call_operand.hbm [shape: f32[1,256], index: 8, kind: input, shape index: {}]   ;;  %s5627_s9 = inlined_call_operand.hbm [shape: bf16[256,512], index: 9, kind: input, shape index: {}]   ;;  %s5628_s10 = inlined_call_operand.vmem [shape: bf16[8,512], index: 10, kind: input, shape index: {}]   ;;  %s5629_s11 = inlined_call_operand.vmem [shape: bf16[8,512], index: 11, kind: input, shape index: {}]   ;;  %s5630_s12 = inlined_call_operand.vmem [shape: f32[1,512], index: 12, kind: input, shape index: {}]   ;;  %s5631_s13 = inlined_call_operand.hbm [shape: bf16[512,256], index: 13, kind: input, shape index: {}]   ;;  %s5632_s14 = inlined_call_operand.vmem [shape: f32[1,256], index: 14, kind: input, shape index: {}]   ;;  %s5633_s15 = inlined_call_operand.vmem [shape: f32[1,256], index: 15, kind: input, shape index: {}]   ;;  %s5634_s16 = inlined_call_operand.<no memory space> [shape: f32[1,1], index: 16, kind: input, shape index: {}]   ;;  %s5635_s17 = inlined_call_operand.hbm [shape: f32[8,8], index: 17, kind: output, shape index: {}]  }
   0x1   :  { %5640 = sst [smem:[#allocation29_spill]] %s5618_s0  ;;  %v22_v0 = vstv %s5634_s16 }
   0x2   :  { %5641 = sst [smem:[#allocation30_spill]] %s5619_s1  ;;  %23 = vst [vmem:[#allocation2] sm:$0x1] %v22_v0 }
   0x3   :  { %24 = vsyncpa [#allocation4], 0 }
   0x4   :  { %25 = vsyncpa [#allocation7], 0 }
   0x5   :  { %26 = vsyncpa [#allocation10], 0 }
   0x6   :  { %27 = vsyncpa [#allocation13], 0 }
   0x7   :  { %28 = vsyncpa [#allocation16], 0 }
   0x8   :  { %29 = vsyncpa [#allocation19], 0 }
   0x9   :  { %30 = vsyncpa [#allocation5], 0  ;;  %s4895_s26 = smov [#allocation6]   ;;  %s4896_s28 = smov [#allocation9]  }
   0xa   :  { %s47_s27 = sshll.u32 %s4895_s26, 4  ;;  %s68_s29 = sshll.u32 %s4896_s28, 4  ;;  %s48_s27 = int_to_ptr.vmem [resolvable:$true] %s47_s27  ;;  %s5008_s29 = int_to_ptr.vmem [resolvable:$true] %s68_s29 }
   0xb   :  { %s5642_s18 = sld [smem:[#allocation30_spill]] }
  0x11   :  { %s4617_s19 = scalar_lea.hbm %s5642_s18, 128 }
  0x12   :  { %p4618_p0 = scmp.ne.s32.totalorder %s5642_s18, %s4617_s19  ;;  %p4621_p1 = scmp.lt.u32.totalorder %s4617_s19, %s5642_s18 }
  0x14   :  { %p4623_p2 = pnand %p4621_p1, %p4618_p0 }
  0x16   :  { %4626 = shalt.err (!%p4623_p2)
}
  0x17   :  { %s4627_s22 = scalar_lea.vmem %s48_s27, 128  ;;  %p4632_p4 = scmp.lt.s32.totalorder %s48_s27, %s48_s27 }
  0x18   :  { %p4628_p3 = scmp.ne.s32.totalorder %s48_s27, %s4627_s22  ;;  %p4633_p5 = scmp.lt.s32.totalorder %s4627_s22, %s4627_s22 }
  0x1a   :  { %p4634_p6 = por %p4633_p5, %p4632_p4 }
  0x1c   :  { %p4635_p7 = pnand %p4634_p6, %p4628_p3 }
  0x1e   :  { %4638 = shalt.err (!%p4635_p7)
}
  0x1f   :  { %50 = dma.hbm_to_vmem [thread:$0]  %s5642_s18, 128, %s48_s27, [#allocation7]  }
  0x20   :  { %s4639_s28 = scalar_lea.hbm %s5621_s3, 4096 }
  0x21   :  { %p4640_p8 = scmp.ne.s32.totalorder %s5621_s3, %s4639_s28  ;;  %p4643_p9 = scmp.lt.u32.totalorder %s4639_s28, %s5621_s3 }
  0x23   :  { %p4645_p10 = pnand %p4643_p9, %p4640_p8 }
  0x25   :  { %4648 = shalt.err (!%p4645_p10)
}
  0x26   :  { %s4649_s1 = scalar_lea.vmem %s5008_s29, 4096  ;;  %p4654_p12 = scmp.lt.s32.totalorder %s5008_s29, %s5008_s29 }
  0x27   :  { %p4650_p11 = scmp.ne.s32.totalorder %s5008_s29, %s4649_s1  ;;  %p4655_p13 = scmp.lt.s32.totalorder %s4649_s1, %s4649_s1 }
  0x29   :  { %p4656_p0 = por %p4655_p13, %p4654_p12 }
  0x2b   :  { %p4657_p1 = pnand %p4656_p0, %p4650_p11 }
  0x2d   :  { %4660 = shalt.err (!%p4657_p1)
}
  0x2e   :  { %s5638_s27 = smov 256   ;;  %s4898_s18 = smov 16  }
  0x2f   :  { %74 = dma.hbm_to_vmem [thread:$0]  %s5621_s3, 4096, %s5008_s29, [#allocation10], %s5638_s27, %s5638_s27, %s4898_s18  }
  0x30   :  { %s4899_s22 = smov [#allocation12]   ;;  %s4661_s26 = scalar_lea.hbm %s5623_s5, 12288 }
  0x31   :  { %s90_s23 = sshll.u32 %s4899_s22, 4  ;;  %p4662_p2 = scmp.ne.s32.totalorder %s5623_s5, %s4661_s26  ;;  %s91_s23 = int_to_ptr.vmem [resolvable:$true] %s90_s23 }
  0x32   :  { %p4665_p3 = scmp.lt.u32.totalorder %s4661_s26, %s5623_s5 }
  0x34   :  { %p4667_p4 = pnand %p4665_p3, %p4662_p2 }
  0x36   :  { %4670 = shalt.err (!%p4667_p4)
}
  0x37   :  { %s4671_s16 = scalar_lea.vmem %s91_s23, 12288  ;;  %p4676_p6 = scmp.lt.s32.totalorder %s91_s23, %s91_s23 }
  0x38   :  { %p4672_p5 = scmp.ne.s32.totalorder %s91_s23, %s4671_s16  ;;  %p4677_p7 = scmp.lt.s32.totalorder %s4671_s16, %s4671_s16 }
  0x3a   :  { %p4678_p8 = por %p4677_p7, %p4676_p6 }
  0x3c   :  { %p4679_p9 = pnand %p4678_p8, %p4672_p5 }
  0x3e   :  { %4682 = shalt.err (!%p4679_p9)
}
  0x3f   :  { %s4900_s3 = smov 192   ;;  %s4901_s29 = smov 12  }
  0x40   :  { %96 = dma.hbm_to_vmem [thread:$0]  %s5623_s5, 12288, %s91_s23, [#allocation13], %s4900_s3, %s4900_s3, %s4901_s29  }
  0x41   :  { %s4902_s21 = smov [#allocation15]   ;;  %s4903_s24 = smov [#allocation18]  }
  0x42   :  { %s112_s22 = sshll.u32 %s4902_s21, 4  ;;  %s134_s25 = sshll.u32 %s4903_s24, 4  ;;  %s113_s22 = int_to_ptr.vmem [resolvable:$true] %s112_s22  ;;  %s135_s25 = int_to_ptr.vmem [resolvable:$true] %s134_s25 }
  0x43   :  { %s4683_s0 = scalar_lea.hbm %s5625_s7, 6144 }
  0x44   :  { %p4684_p10 = scmp.ne.s32.totalorder %s5625_s7, %s4683_s0  ;;  %p4687_p11 = scmp.lt.u32.totalorder %s4683_s0, %s5625_s7 }
  0x46   :  { %p4689_p12 = pnand %p4687_p11, %p4684_p10 }
  0x48   :  { %4692 = shalt.err (!%p4689_p12)
}
  0x49   :  { %s4693_s5 = scalar_lea.vmem %s113_s22, 6144  ;;  %p4698_p0 = scmp.lt.s32.totalorder %s113_s22, %s113_s22 }
  0x4a   :  { %p4694_p13 = scmp.ne.s32.totalorder %s113_s22, %s4693_s5  ;;  %p4699_p1 = scmp.lt.s32.totalorder %s4693_s5, %s4693_s5 }
  0x4c   :  { %p4700_p2 = por %p4699_p1, %p4698_p0 }
  0x4e   :  { %p4701_p3 = pnand %p4700_p2, %p4694_p13 }
  0x50   :  { %4704 = shalt.err (!%p4701_p3)
}
  0x51   :  { %s4904_s23 = smov 128   ;;  %s4905_s3 = smov 8  }
  0x52   :  { %118 = dma.hbm_to_vmem [thread:$0]  %s5625_s7, 6144, %s113_s22, [#allocation16], %s4904_s23, %s4904_s23, %s4905_s3  }
  0x53   :  { %s4705_s21 = scalar_lea.hbm %s5627_s9, 8192 }
  0x54   :  { %p4706_p4 = scmp.ne.s32.totalorder %s5627_s9, %s4705_s21  ;;  %p4709_p5 = scmp.lt.u32.totalorder %s4705_s21, %s5627_s9 }
  0x56   :  { %p4711_p6 = pnand %p4709_p5, %p4706_p4 }
  0x58   :  { %4714 = shalt.err (!%p4711_p6)
}
  0x59   :  { %s4715_s30 = scalar_lea.vmem %s135_s25, 8192  ;;  %p4720_p8 = scmp.lt.s32.totalorder %s135_s25, %s135_s25 }
  0x5a   :  { %p4716_p7 = scmp.ne.s32.totalorder %s135_s25, %s4715_s30  ;;  %p4721_p9 = scmp.lt.s32.totalorder %s4715_s30, %s4715_s30 }
  0x5c   :  { %p4722_p10 = por %p4721_p9, %p4720_p8 }
  0x5e   :  { %p4723_p11 = pnand %p4722_p10, %p4716_p7 }
  0x60   :  { %4726 = shalt.err (!%p4723_p11)
}
  0x61   :  { %s5643_s7 = smov 256   ;;  %s4906_s16 = smov [#allocation3]  }
  0x62   :  { %140 = dma.hbm_to_vmem [thread:$0]  %s5627_s9, 8192, %s135_s25, [#allocation19], %s5643_s7, %s5643_s7, %s4898_s18  }
  0x63   :  { %s37_s5 = sshll.u32 %s4906_s16, 4  ;;  %s4907_s29 = smov [#allocation8]   ;;  %s38_s5 = int_to_ptr.vmem [resolvable:$true] %s37_s5 }
  0x64   :  { %s56_s1 = sshll.u32 %s4907_s29, 4  ;;  %s5644_s21 = sld [smem:[#allocation29_spill]]  ;;  %s57_s1 = int_to_ptr.vmem [resolvable:$true] %s56_s1 }
  0x6a   :  { %s4727_s24 = scalar_lea.hbm %s5644_s21, 128 }
  0x6b   :  { %p4728_p12 = scmp.ne.s32.totalorder %s5644_s21, %s4727_s24  ;;  %p4731_p13 = scmp.lt.u32.totalorder %s4727_s24, %s5644_s21 }
  0x6d   :  { %p4733_p0 = pnand %p4731_p13, %p4728_p12 }
  0x6f   :  { %4736 = shalt.err (!%p4733_p0)
}
  0x70   :  { %s4737_s9 = scalar_lea.vmem %s38_s5, 128  ;;  %p4742_p2 = scmp.lt.s32.totalorder %s38_s5, %s38_s5 }
  0x71   :  { %p4738_p1 = scmp.ne.s32.totalorder %s38_s5, %s4737_s9  ;;  %p4743_p3 = scmp.lt.s32.totalorder %s4737_s9, %s4737_s9 }
  0x73   :  { %p4744_p4 = por %p4743_p3, %p4742_p2 }
  0x75   :  { %p4745_p5 = pnand %p4744_p4, %p4738_p1 }
  0x77   :  { %4748 = shalt.err (!%p4745_p5)
}
  0x78   :  { %40 = dma.hbm_to_vmem [thread:$0]  %s5644_s21, 128, %s38_s5, [#allocation4]  }
  0x79   :  { %s4749_s19 = scalar_lea.hbm %s5620_s2, 1024 }
  0x7a   :  { %p4750_p6 = scmp.ne.s32.totalorder %s5620_s2, %s4749_s19  ;;  %p4753_p7 = scmp.lt.u32.totalorder %s4749_s19, %s5620_s2 }
  0x7c   :  { %p4755_p8 = pnand %p4753_p7, %p4750_p6 }
  0x7e   :  { %4758 = shalt.err (!%p4755_p8)
}
  0x7f   :  { %s4759_s24 = scalar_lea.vmem %s57_s1, 1024  ;;  %p4764_p10 = scmp.lt.s32.totalorder %s57_s1, %s57_s1 }
  0x80   :  { %p4760_p9 = scmp.ne.s32.totalorder %s57_s1, %s4759_s24  ;;  %p4765_p11 = scmp.lt.s32.totalorder %s4759_s24, %s4759_s24 }
  0x82   :  { %p4766_p12 = por %p4765_p11, %p4764_p10 }
  0x84   :  { %p4767_p13 = pnand %p4766_p12, %p4760_p9 }
  0x86   :  { %4770 = shalt.err (!%p4767_p13)
}
  0x87   :  { %62 = dma.hbm_to_vmem [thread:$0]  %s5620_s2, 1024, %s57_s1, [#allocation7], %s4904_s23, %s4904_s23, %s4905_s3  }
  0x88   :  { %s4908_s26 = smov [#allocation11]   ;;  %s4909_s0 = smov [#allocation14]  }
  0x89   :  { %s81_s28 = sshll.u32 %s4908_s26, 4  ;;  %s103_s30 = sshll.u32 %s4909_s0, 4  ;;  %s82_s28 = int_to_ptr.vmem [resolvable:$true] %s81_s28  ;;  %s104_s30 = int_to_ptr.vmem [resolvable:$true] %s103_s30 }
  0x8a   :  { %s4771_s25 = scalar_lea.hbm %s5622_s4, 64 }
  0x8b   :  { %p4772_p0 = scmp.ne.s32.totalorder %s5622_s4, %s4771_s25  ;;  %p4775_p1 = scmp.lt.u32.totalorder %s4771_s25, %s5622_s4 }
  0x8d   :  { %p4777_p2 = pnand %p4775_p1, %p4772_p0 }
  0x8f   :  { %4780 = shalt.err (!%p4777_p2)
}
  0x90   :  { %s4781_s2 = scalar_lea.vmem %s82_s28, 64  ;;  %p4786_p4 = scmp.lt.s32.totalorder %s82_s28, %s82_s28 }
  0x91   :  { %p4782_p3 = scmp.ne.s32.totalorder %s82_s28, %s4781_s2  ;;  %p4787_p5 = scmp.lt.s32.totalorder %s4781_s2, %s4781_s2 }
  0x93   :  { %p4788_p6 = por %p4787_p5, %p4786_p4 }
  0x95   :  { %p4789_p7 = pnand %p4788_p6, %p4782_p3 }
  0x97   :  { %4792 = shalt.err (!%p4789_p7)
}
  0x98   :  { %84 = dma.hbm_to_vmem [thread:$0]  %s5622_s4, 64, %s82_s28, [#allocation10]  }
  0x99   :  { %s4793_s24 = scalar_lea.hbm %s5624_s6, 48 }
  0x9a   :  { %p4794_p8 = scmp.ne.s32.totalorder %s5624_s6, %s4793_s24  ;;  %p4797_p9 = scmp.lt.u32.totalorder %s4793_s24, %s5624_s6 }
  0x9c   :  { %p4799_p10 = pnand %p4797_p9, %p4794_p8 }
  0x9e   :  { %4802 = shalt.err (!%p4799_p10)
}
  0x9f   :  { %s4803_s9 = scalar_lea.vmem %s104_s30, 48  ;;  %s4807_s18 = scalar_lea.vmem %s104_s30, 64 }
  0xa0   :  { %p4804_p11 = scmp.ne.s32.totalorder %s104_s30, %s4803_s9  ;;  %p4808_p12 = scmp.lt.s32.totalorder %s104_s30, %s104_s30 }
  0xa1   :  { %p4809_p13 = scmp.lt.s32.totalorder %s4807_s18, %s4803_s9 }
  0xa3   :  { %p4810_p0 = por %p4809_p13, %p4808_p12 }
  0xa5   :  { %p4811_p1 = pnand %p4810_p0, %p4804_p11 }
  0xa7   :  { %4814 = shalt.err (!%p4811_p1)
}
  0xa8   :  { %106 = dma.hbm_to_vmem [thread:$0]  %s5624_s6, 48, %s104_s30, [#allocation13]  }
  0xa9   :  { %s4910_s25 = smov [#allocation17]   ;;  %s4911_s22 = smov [#allocation20]  }
  0xaa   :  { %s125_s7 = sshll.u32 %s4910_s25, 4  ;;  %s152_s19 = sshll.u32 %s4911_s22, 4  ;;  %s126_s7 = int_to_ptr.vmem [resolvable:$true] %s125_s7  ;;  %s153_s19 = int_to_ptr.vmem [resolvable:$true] %s152_s19 }
  0xab   :  { %s4815_s1 = scalar_lea.hbm %s5626_s8, 32 }
  0xac   :  { %p4816_p2 = scmp.ne.s32.totalorder %s5626_s8, %s4815_s1  ;;  %p4819_p3 = scmp.lt.u32.totalorder %s4815_s1, %s5626_s8 }
  0xae   :  { %p4821_p4 = pnand %p4819_p3, %p4816_p2 }
  0xb0   :  { %4824 = shalt.err (!%p4821_p4)
}
  0xb1   :  { %s4825_s6 = scalar_lea.vmem %s126_s7, 32  ;;  %p4830_p6 = scmp.lt.s32.totalorder %s126_s7, %s126_s7 }
  0xb2   :  { %p4826_p5 = scmp.ne.s32.totalorder %s126_s7, %s4825_s6  ;;  %p4831_p7 = scmp.lt.s32.totalorder %s4825_s6, %s4825_s6 }
  0xb4   :  { %p4832_p8 = por %p4831_p7, %p4830_p6 }
  0xb6   :  { %p4833_p9 = pnand %p4832_p8, %p4826_p5 }
  0xb8   :  { %4836 = shalt.err (!%p4833_p9)
}
  0xb9   :  { %128 = dma.hbm_to_vmem [thread:$0]  %s5626_s8, 32, %s126_s7, [#allocation16]  }
  0xba   :  { %s4837_s0 = scalar_lea.hbm %s5631_s13, 8192 }
  0xbb   :  { %p4838_p10 = scmp.ne.s32.totalorder %s5631_s13, %s4837_s0  ;;  %p4841_p11 = scmp.lt.u32.totalorder %s4837_s0, %s5631_s13 }
  0xbd   :  { %p4843_p12 = pnand %p4841_p11, %p4838_p10 }
  0xbf   :  { %4846 = shalt.err (!%p4843_p12)
}
  0xc0   :  { %s4847_s25 = scalar_lea.vmem %s153_s19, 8192  ;;  %p4852_p0 = scmp.lt.s32.totalorder %s153_s19, %s153_s19 }
  0xc1   :  { %p4848_p13 = scmp.ne.s32.totalorder %s153_s19, %s4847_s25  ;;  %p4853_p1 = scmp.lt.s32.totalorder %s4847_s25, %s4847_s25 }
  0xc3   :  { %p4854_p2 = por %p4853_p1, %p4852_p0 }
  0xc5   :  { %p4855_p3 = pnand %p4854_p2, %p4848_p13 }
  0xc7   :  { %4858 = shalt.err (!%p4855_p3)
}
  0xc8   :  { %158 = dma.hbm_to_vmem [thread:$0]  %s5631_s13, 8192, %s153_s19, [#allocation19], %s4904_s23, %s4904_s23, %s4905_s3  }
  0xc9   :  { %4881 = dma.done.wait [#allocation4], 128  }
  0xca   :  { %4882 = vsyncadd [#allocation4], 4294967168 }
  0xcb   :  { %4883 = dma.done.wait [#allocation7], 1152  }
  0xcc   :  { %4884 = vsyncadd [#allocation7], 4294966144 }
  0xcd   :  { %4885 = dma.done.wait [#allocation10], 4160  }
  0xce   :  { %4886 = vsyncadd [#allocation10], 4294963136 }
  0xcf   :  { %4887 = dma.done.wait [#allocation13], 12336  }
  0xd0   :  { %4888 = vsyncadd [#allocation13], 4294954960 }
  0xd1   :  { %4889 = dma.done.wait [#allocation16], 6176  }
  0xd2   :  { %4890 = vsyncadd [#allocation16], 4294961120 }
  0xd3   :  { %4891 = dma.done.wait [#allocation19], 16384  }
  0xd4   :  { %4892 = vsyncadd [#allocation19], 4294950912  ;;  %v4912_v1 = vmov 0   ;;  %v4137_v2 = vld [vmem:[#allocation9 + $0x4] ss:$16 sps:$4 sm:$0xff]   ;;  %vm1816_vm4 = vcmask 1043456  }
  0xd5   :  { %447 = vmatprep.mubr.bf16.mxu0 %v4912_v1  ;;  %488 = vmatprep.mubr.bf16.mxu1 %v4912_v1  ;;  %v4139_v3 = vld [vmem:[#allocation9] ss:$16 sps:$4 sm:$0xff]   ;;  %v4140_v4 = vld [vmem:[#allocation9 + $0xc] ss:$16 sps:$4 sm:$0xff]   ;;  %v4142_v5 = vld [vmem:[#allocation9 + $0x8] ss:$16 sps:$4 sm:$0xff]  }
  0xd6   :  { %4136 = vset.pattern.permute.xlu0 %v4912_v1  ;;  %415 = vmatprep.subr.bf16.mxu0 %v4137_v2  ;;  %v4143_v6 = vld [vmem:[#allocation9 + $0x24] ss:$16 sps:$4 sm:$0xff]   ;;  %v4145_v7 = vld [vmem:[#allocation9 + $0x20] ss:$16 sps:$4 sm:$0xff]   ;;  %v4146_v8 = vld [vmem:[#allocation9 + $0x2c] ss:$16 sps:$4 sm:$0xff]  }
  0xd7   :  { %416 = vmatpush1.bf16.msra.mxu0 %v4139_v3  ;;  %456 = vmatprep.subr.bf16.mxu1 %v4140_v4  ;;  %v4148_v9 = vld [vmem:[#allocation9 + $0x28] ss:$16 sps:$4 sm:$0xff]   ;;  %v4149_v10 = vld [vmem:[#allocation9 + $0x44] ss:$16 sps:$4 sm:$0xff]   ;;  %v4151_v11 = vld [vmem:[#allocation9 + $0x40] ss:$16 sps:$4 sm:$0xff]  }
  0xd8   :  { %457 = vmatpush1.bf16.msra.mxu1 %v4142_v5  ;;  %417 = vmatprep.subr.bf16.mxu0 %v4143_v6  ;;  %v4152_v12 = vld [vmem:[#allocation9 + $0x4c] ss:$16 sps:$4 sm:$0xff]   ;;  %v4155_v13 = vld [vmem:[#allocation9 + $0x64] ss:$16 sps:$4 sm:$0xff]   ;;  %v4154_v14 = vld [vmem:[#allocation9 + $0x48] ss:$16 sps:$4 sm:$0xff]  }
  0xd9   :  { %458 = vmatprep.subr.bf16.mxu1 %v4146_v8  ;;  %v4158_v15 = vld [vmem:[#allocation9 + $0x6c] ss:$16 sps:$4 sm:$0xff]   ;;  %v4157_v16 = vld [vmem:[#allocation9 + $0x60] ss:$16 sps:$4 sm:$0xff]   ;;  %v4161_v17 = vld [vmem:[#allocation9 + $0x84] ss:$16 sps:$4 sm:$0xff]  }
  0xda   :  { %v4160_v18 = vld [vmem:[#allocation9 + $0x68] ss:$16 sps:$4 sm:$0xff]   ;;  %v4164_v19 = vld [vmem:[#allocation9 + $0x8c] ss:$16 sps:$4 sm:$0xff]   ;;  %v4163_v20 = vld [vmem:[#allocation9 + $0x80] ss:$16 sps:$4 sm:$0xff]  }
  0xdb   :  { %418 = vmatpush1.bf16.msra.mxu0 %v4145_v7  ;;  %v4167_v21 = vld [vmem:[#allocation9 + $0xa4] ss:$16 sps:$4 sm:$0xff]   ;;  %v4166_v22 = vld [vmem:[#allocation9 + $0x88] ss:$16 sps:$4 sm:$0xff]   ;;  %v4170_v23 = vld [vmem:[#allocation9 + $0xac] ss:$16 sps:$4 sm:$0xff]  }
  0xdc   :  { %419 = vmatprep.subr.bf16.mxu0 %v4149_v10  ;;  %459 = vmatpush1.bf16.msra.mxu1 %v4148_v9  ;;  %v4169_v24 = vld [vmem:[#allocation9 + $0xa0] ss:$16 sps:$4 sm:$0xff]   ;;  %v4173_v25 = vld [vmem:[#allocation9 + $0xc4] ss:$16 sps:$4 sm:$0xff]   ;;  %v4172_v26 = vld [vmem:[#allocation9 + $0xa8] ss:$16 sps:$4 sm:$0xff]  }
  0xdd   :  { %460 = vmatprep.subr.bf16.mxu1 %v4152_v12  ;;  %v4176_v27 = vld [vmem:[#allocation9 + $0xcc] ss:$16 sps:$4 sm:$0xff]   ;;  %v4175_v28 = vld [vmem:[#allocation9 + $0xc0] ss:$16 sps:$4 sm:$0xff]   ;;  %v4179_v29 = vld [vmem:[#allocation9 + $0xe4] ss:$16 sps:$4 sm:$0xff]  }
  0xde   :  { %v4178_v30 = vld [vmem:[#allocation9 + $0xc8] ss:$16 sps:$4 sm:$0xff]   ;;  %v4181_v31 = vld [vmem:[#allocation9 + $0xe0] ss:$16 sps:$4 sm:$0xff]   ;;  %v4182_v32 = vld [vmem:[#allocation9 + $0xec] ss:$16 sps:$4 sm:$0xff]  }
  0xdf   :  { %420 = vmatpush1.bf16.msra.mxu0 %v4151_v11  ;;  %v199_v33 = vld [vmem:[#allocation3] sm:$0xff]  ;;  %v4184_v35 = vld [vmem:[#allocation9 + $0xe8] ss:$16 sps:$4 sm:$0xff]   ;;  %v4196_v39 = vld [vmem:[#allocation12 + $0x19c] ss:$12 sps:$4 sm:$0xff]   ;;  %vm5639_vm5 = vcmask 64512  }
  0xe0   :  { %421 = vmatprep.subr.bf16.mxu0 %v4155_v13  ;;  %461 = vmatpush1.bf16.msra.mxu1 %v4154_v14  ;;  %v4190_v34 = vld [vmem:[#allocation12 + $0x184] ss:$12 sps:$4 sm:$0xff]   ;;  %v200_v36 = vpack.c.bf16 %v199_v33, %v199_v33  ;;  %v4188_v38 = vld [vmem:[#allocation12 + $0x180] ss:$12 sps:$4 sm:$0xff]   ;;  %v4193_v41 = vld [vmem:[#allocation12 + $0x1c] ss:$12 sps:$4 sm:$0xff]  }
  0xe1   :  { %462 = vmatprep.subr.bf16.mxu1 %v4158_v15  ;;  %v4187_v37 = vld [vmem:[#allocation12 + $0x4] ss:$12 sps:$4 sm:$0xff]   ;;  %v4185_v40 = vld [vmem:[#allocation12] ss:$12 sps:$4 sm:$0xff]   ;;  %v4206_v50 = vld [vmem:[#allocation12 + $0x1c8] ss:$12 sps:$4 sm:$0xff]  }
  0xe2   :  { %v4194_v42 = vld [vmem:[#allocation12 + $0x198] ss:$12 sps:$4 sm:$0xff]   ;;  %v4202_v43 = vld [vmem:[#allocation12 + $0x1b4] ss:$12 sps:$4 sm:$0xff]   ;;  %v4200_v46 = vld [vmem:[#allocation12 + $0x1b0] ss:$12 sps:$4 sm:$0xff]  }
  0xe3   :  { %422 = vmatpush1.bf16.msra.mxu0 %v4157_v16  ;;  %v4191_v44 = vld [vmem:[#allocation12 + $0x18] ss:$12 sps:$4 sm:$0xff]   ;;  %v4199_v45 = vld [vmem:[#allocation12 + $0x34] ss:$12 sps:$4 sm:$0xff]   ;;  %v4197_v48 = vld [vmem:[#allocation12 + $0x30] ss:$12 sps:$4 sm:$0xff]  }
  0xe4   :  { %423 = vmatprep.subr.bf16.mxu0 %v4161_v17  ;;  %463 = vmatpush1.bf16.msra.mxu1 %v4160_v18  ;;  %v4208_v47 = vld [vmem:[#allocation12 + $0x1cc] ss:$12 sps:$4 sm:$0xff]   ;;  %v4214_v51 = vld [vmem:[#allocation12 + $0x1e4] ss:$12 sps:$4 sm:$0xff]   ;;  %v4203_v52 = vld [vmem:[#allocation12 + $0x48] ss:$12 sps:$4 sm:$0xff]  }
  0xe5   :  { %464 = vmatprep.subr.bf16.mxu1 %v4164_v19  ;;  %v4205_v49 = vld [vmem:[#allocation12 + $0x4c] ss:$12 sps:$4 sm:$0xff]   ;;  %v4211_v53 = vld [vmem:[#allocation12 + $0x64] ss:$12 sps:$4 sm:$0xff]   ;;  %v4220_v55 = vld [vmem:[#allocation12 + $0x1fc] ss:$12 sps:$4 sm:$0xff]  }
  0xe6   :  { %v4212_v54 = vld [vmem:[#allocation12 + $0x1e0] ss:$12 sps:$4 sm:$0xff]   ;;  %v4217_v57 = vld [vmem:[#allocation12 + $0x7c] ss:$12 sps:$4 sm:$0xff]   ;;  %v4218_v58 = vld [vmem:[#allocation12 + $0x1f8] ss:$12 sps:$4 sm:$0xff]  }
  0xe7   :  { %424 = vmatpush1.bf16.msra.mxu0 %v4163_v20  ;;  %v4209_v56 = vld [vmem:[#allocation12 + $0x60] ss:$12 sps:$4 sm:$0xff]   ;;  %v4215_v60 = vld [vmem:[#allocation12 + $0x78] ss:$12 sps:$4 sm:$0xff]   ;;  %v4224_v62 = vld [vmem:[#allocation12 + $0x210] ss:$12 sps:$4 sm:$0xff]  }
  0xe8   :  { %425 = vmatprep.subr.bf16.mxu0 %v4167_v21  ;;  %465 = vmatpush1.bf16.msra.mxu1 %v4166_v22  ;;  %v4226_v59 = vld [vmem:[#allocation12 + $0x214] ss:$12 sps:$4 sm:$0xff]   ;;  %v4232_v63 = vld [vmem:[#allocation12 + $0x22c] ss:$12 sps:$4 sm:$0xff]   ;;  %v4221_v0 = vld [vmem:[#allocation12 + $0x90] ss:$12 sps:$4 sm:$0xff]  }
  0xe9   :  { %466 = vmatprep.subr.bf16.mxu1 %v4170_v23  ;;  %v4223_v61 = vld [vmem:[#allocation12 + $0x94] ss:$12 sps:$4 sm:$0xff]   ;;  %v4229_v2 = vld [vmem:[#allocation12 + $0xac] ss:$12 sps:$4 sm:$0xff]   ;;  %v4238_v4 = vld [vmem:[#allocation12 + $0x244] ss:$12 sps:$4 sm:$0xff]  }
  0xea   :  { %v4230_v3 = vld [vmem:[#allocation12 + $0x228] ss:$12 sps:$4 sm:$0xff]   ;;  %v4235_v6 = vld [vmem:[#allocation12 + $0xc4] ss:$12 sps:$4 sm:$0xff]   ;;  %v4236_v7 = vld [vmem:[#allocation12 + $0x240] ss:$12 sps:$4 sm:$0xff]  }
  0xeb   :  { %426 = vmatpush1.bf16.msra.mxu0 %v4169_v24  ;;  %v4227_v5 = vld [vmem:[#allocation12 + $0xa8] ss:$12 sps:$4 sm:$0xff]   ;;  %v4233_v9 = vld [vmem:[#allocation12 + $0xc0] ss:$12 sps:$4 sm:$0xff]   ;;  %v4242_v11 = vld [vmem:[#allocation12 + $0x258] ss:$12 sps:$4 sm:$0xff]  }
  0xec   :  { %427 = vmatprep.subr.bf16.mxu0 %v4173_v25  ;;  %467 = vmatpush1.bf16.msra.mxu1 %v4172_v26  ;;  %v4244_v8 = vld [vmem:[#allocation12 + $0x25c] ss:$12 sps:$4 sm:$0xff]   ;;  %v4250_v12 = vld [vmem:[#allocation12 + $0x274] ss:$12 sps:$4 sm:$0xff]   ;;  %v4239_v13 = vld [vmem:[#allocation12 + $0xd8] ss:$12 sps:$4 sm:$0xff]  }
  0xed   :  { %468 = vmatprep.subr.bf16.mxu1 %v4176_v27  ;;  %v4241_v10 = vld [vmem:[#allocation12 + $0xdc] ss:$12 sps:$4 sm:$0xff]   ;;  %v4247_v14 = vld [vmem:[#allocation12 + $0xf4] ss:$12 sps:$4 sm:$0xff]   ;;  %v4256_v16 = vld [vmem:[#allocation12 + $0x28c] ss:$12 sps:$4 sm:$0xff]  }
  0xee   :  { %v4248_v15 = vld [vmem:[#allocation12 + $0x270] ss:$12 sps:$4 sm:$0xff]   ;;  %v4253_v18 = vld [vmem:[#allocation12 + $0x10c] ss:$12 sps:$4 sm:$0xff]   ;;  %v4254_v19 = vld [vmem:[#allocation12 + $0x288] ss:$12 sps:$4 sm:$0xff]  }
  0xef   :  { %428 = vmatpush1.bf16.msra.mxu0 %v4175_v28  ;;  %v4245_v17 = vld [vmem:[#allocation12 + $0xf0] ss:$12 sps:$4 sm:$0xff]   ;;  %v4251_v21 = vld [vmem:[#allocation12 + $0x108] ss:$12 sps:$4 sm:$0xff]   ;;  %v4260_v23 = vld [vmem:[#allocation12 + $0x2a0] ss:$12 sps:$4 sm:$0xff]  }
  0xf0   :  { %429 = vmatprep.subr.bf16.mxu0 %v4179_v29  ;;  %469 = vmatpush1.bf16.msra.mxu1 %v4178_v30  ;;  %v4262_v20 = vld [vmem:[#allocation12 + $0x2a4] ss:$12 sps:$4 sm:$0xff]   ;;  %v4257_v24 = vld [vmem:[#allocation12 + $0x120] ss:$12 sps:$4 sm:$0xff]   ;;  %v4265_v25 = vld [vmem:[#allocation12 + $0x13c] ss:$12 sps:$4 sm:$0xff]  }
  0xf1   :  { %470 = vmatprep.subr.bf16.mxu1 %v4182_v32  ;;  %v4259_v22 = vld [vmem:[#allocation12 + $0x124] ss:$12 sps:$4 sm:$0xff]   ;;  %v4268_v27 = vld [vmem:[#allocation12 + $0x2bc] ss:$12 sps:$4 sm:$0xff]   ;;  %v4271_v29 = vld [vmem:[#allocation12 + $0x154] ss:$12 sps:$4 sm:$0xff]  }
  0xf2   :  { %v4263_v26 = vld [vmem:[#allocation12 + $0x138] ss:$12 sps:$4 sm:$0xff]   ;;  %v4269_v30 = vld [vmem:[#allocation12 + $0x150] ss:$12 sps:$4 sm:$0xff]  }
  0xf3   :  { %430 = vmatpush1.bf16.msra.mxu0 %v4181_v31  ;;  %v4266_v28 = vld [vmem:[#allocation12 + $0x2b8] ss:$12 sps:$4 sm:$0xff]   ;;  %v4274_v31 = vld [vmem:[#allocation12 + $0x2d4] ss:$12 sps:$4 sm:$0xff]   ;;  %v4272_v32 = vld [vmem:[#allocation12 + $0x2d0] ss:$12 sps:$4 sm:$0xff]  }
  0xf4   :  { %1211 = vmatprep.subr.bf16.mxu0 %v4190_v34  ;;  %471 = vmatpush1.bf16.msra.mxu1 %v4184_v35  ;;  %v4277_v33 = vld [vmem:[#allocation12 + $0x16c] ss:$12 sps:$4 sm:$0xff]   ;;  %v4275_v34 = vld [vmem:[#allocation12 + $0x168] ss:$12 sps:$4 sm:$0xff]  }
  0xf5   :  { %1170 = vmatprep.subr.bf16.mxu1 %v4187_v37  ;;  %v4280_v35 = vld [vmem:[#allocation12 + $0x2ec] ss:$12 sps:$4 sm:$0xff]   ;;  %v4281_v37 = vld [vmem:[#allocation12 + $0xc8] ss:$12 sps:$4 sm:$0xff]  }
  0xf6   :  { %448 = vmatmul.mubr.bf16.vlgmr.msra.gmra.mrb[0].mxu0 %v200_v36 }
  0xf7   :  { %1212 = vmatpush1.bf16.msra.mxu0 %v4188_v38  ;;  %489 = vmatmul.mubr.bf16.vlgmr.msra.gmra.mrb[0].mxu1 %v200_v36  ;;  %v4278_v36 = vld [vmem:[#allocation12 + $0x2e8] ss:$12 sps:$4 sm:$0xff]   ;;  %v235_v38 = vlaneseq }
  0xf8   :  { %1213 = vmatprep.subr.bf16.mxu0 %v4196_v39  ;;  %1171 = vmatpush1.bf16.msra.mxu1 %v4185_v40 }
  0xf9   :  { %1172 = vmatprep.subr.bf16.mxu1 %v4193_v41  ;;  %v5166_v39 = vshrl.u32 %v235_v38, 7  ;;  %v233_v41 = vld [vmem:[#allocation11] sm:$0xf] }
  0xfb   :  { %1214 = vmatpush1.bf16.msra.mxu0 %v4194_v42  ;;  %v5169_v40 = vsub.s32 0, %v5166_v39  ;;  %v5172_v42 = vsub.s32 1, %v5166_v39 }
  0xfc   :  { %1215 = vmatprep.subr.bf16.mxu0 %v4202_v43  ;;  %1173 = vmatpush1.bf16.msra.mxu1 %v4191_v44  ;;  %v5175_v43 = vsub.s32 2, %v5166_v39  ;;  %v5178_v44 = vsub.s32 3, %v5166_v39 }
  0xfd   :  { %1174 = vmatprep.subr.bf16.mxu1 %v4199_v45  ;;  %v238_v45 = vrot.slane %v233_v41, %v5169_v40 }
  0xff   :  { %1216 = vmatpush1.bf16.msra.mxu0 %v4200_v46  ;;  %v242_v46 = vrot.slane %v233_v41, %v5172_v42 }
 0x100   :  { %1217 = vmatprep.subr.bf16.mxu0 %v4208_v47  ;;  %1175 = vmatpush1.bf16.msra.mxu1 %v4197_v48  ;;  %v246_v47 = vrot.slane %v233_v41, %v5175_v43 }
 0x101   :  { %1176 = vmatprep.subr.bf16.mxu1 %v4205_v49  ;;  %v250_v49 = vrot.slane %v233_v41, %v5178_v44  ;;  %v4310_v41 = vld [vmem:[#allocation12 + $0x218] ss:$12 sps:$4 sm:$0xff]  }
 0x103   :  { %1218 = vmatpush1.bf16.msra.mxu0 %v4206_v50 }
 0x104   :  { %1219 = vmatprep.subr.bf16.mxu0 %v4214_v51  ;;  %1177 = vmatpush1.bf16.msra.mxu1 %v4203_v52 }
 0x105   :  { %1178 = vmatprep.subr.bf16.mxu1 %v4211_v53 }
 0x107   :  { %1220 = vmatpush1.bf16.msra.mxu0 %v4212_v54 }
 0x108   :  { %1221 = vmatprep.subr.bf16.mxu0 %v4220_v55  ;;  %1179 = vmatpush1.bf16.msra.mxu1 %v4209_v56 }
 0x109   :  { %1180 = vmatprep.subr.bf16.mxu1 %v4217_v57 }
 0x10b   :  { %1222 = vmatpush1.bf16.msra.mxu0 %v4218_v58 }
 0x10c   :  { %1223 = vmatprep.subr.bf16.mxu0 %v4226_v59  ;;  %1181 = vmatpush1.bf16.msra.mxu1 %v4215_v60 }
 0x10d   :  { %1182 = vmatprep.subr.bf16.mxu1 %v4223_v61 }
 0x10f   :  { %1224 = vmatpush1.bf16.msra.mxu0 %v4224_v62 }
 0x110   :  { %1225 = vmatprep.subr.bf16.mxu0 %v4232_v63  ;;  %1183 = vmatpush1.bf16.msra.mxu1 %v4221_v0 }
 0x111   :  { %1184 = vmatprep.subr.bf16.mxu1 %v4229_v2 }
 0x113   :  { %1226 = vmatpush1.bf16.msra.mxu0 %v4230_v3 }
 0x114   :  { %1227 = vmatprep.subr.bf16.mxu0 %v4238_v4  ;;  %1185 = vmatpush1.bf16.msra.mxu1 %v4227_v5 }
 0x115   :  { %1186 = vmatprep.subr.bf16.mxu1 %v4235_v6  ;;  %v4282_v6 = vld [vmem:[#allocation12 + $0x8] ss:$12 sps:$4 sm:$0xff]  }
 0x117   :  { %1228 = vmatpush1.bf16.msra.mxu0 %v4236_v7 }
 0x118   :  { %1229 = vmatprep.subr.bf16.mxu0 %v4244_v8  ;;  %1187 = vmatpush1.bf16.msra.mxu1 %v4233_v9 }
 0x119   :  { %1188 = vmatprep.subr.bf16.mxu1 %v4241_v10 }
 0x11b   :  { %1230 = vmatpush1.bf16.msra.mxu0 %v4242_v11  ;;  %v4283_v11 = vld [vmem:[#allocation12 + $0xe0] ss:$12 sps:$4 sm:$0xff]  }
 0x11c   :  { %1231 = vmatprep.subr.bf16.mxu0 %v4250_v12  ;;  %1189 = vmatpush1.bf16.msra.mxu1 %v4239_v13  ;;  %v4284_v12 = vld [vmem:[#allocation12 + $0x20] ss:$12 sps:$4 sm:$0xff]   ;;  %v4285_v13 = vld [vmem:[#allocation12 + $0xf8] ss:$12 sps:$4 sm:$0xff]  }
 0x11d   :  { %1190 = vmatprep.subr.bf16.mxu1 %v4247_v14  ;;  %v4286_v14 = vld [vmem:[#allocation12 + $0x38] ss:$12 sps:$4 sm:$0xff]  }
 0x11f   :  { %1232 = vmatpush1.bf16.msra.mxu0 %v4248_v15  ;;  %v4287_v15 = vld [vmem:[#allocation12 + $0x110] ss:$12 sps:$4 sm:$0xff]  }
 0x120   :  { %1233 = vmatprep.subr.bf16.mxu0 %v4256_v16  ;;  %1191 = vmatpush1.bf16.msra.mxu1 %v4245_v17  ;;  %v4288_v16 = vld [vmem:[#allocation12 + $0x50] ss:$12 sps:$4 sm:$0xff]   ;;  %v4289_v17 = vld [vmem:[#allocation12 + $0x128] ss:$12 sps:$4 sm:$0xff]  }
 0x121   :  { %1192 = vmatprep.subr.bf16.mxu1 %v4253_v18  ;;  %v4290_v18 = vld [vmem:[#allocation12 + $0x68] ss:$12 sps:$4 sm:$0xff]  }
 0x123   :  { %1234 = vmatpush1.bf16.msra.mxu0 %v4254_v19  ;;  %v4291_v19 = vld [vmem:[#allocation12 + $0x140] ss:$12 sps:$4 sm:$0xff]  }
 0x124   :  { %1235 = vmatprep.subr.bf16.mxu0 %v4262_v20  ;;  %1193 = vmatpush1.bf16.msra.mxu1 %v4251_v21  ;;  %v4292_v20 = vld [vmem:[#allocation12 + $0x80] ss:$12 sps:$4 sm:$0xff]   ;;  %v4293_v21 = vld [vmem:[#allocation12 + $0x158] ss:$12 sps:$4 sm:$0xff]  }
 0x125   :  { %1194 = vmatprep.subr.bf16.mxu1 %v4259_v22  ;;  %v4294_v22 = vld [vmem:[#allocation12 + $0x98] ss:$12 sps:$4 sm:$0xff]  }
 0x127   :  { %1236 = vmatpush1.bf16.msra.mxu0 %v4260_v23  ;;  %v4295_v23 = vld [vmem:[#allocation12 + $0x170] ss:$12 sps:$4 sm:$0xff]  }
 0x128   :  { %1195 = vmatpush1.bf16.msra.mxu1 %v4257_v24  ;;  %1237 = vmatprep.subr.bf16.mxu0 %v4268_v27  ;;  %v4296_v24 = vld [vmem:[#allocation12 + $0xb0] ss:$12 sps:$4 sm:$0xff]   ;;  %v4299_v27 = vld [vmem:[#allocation12 + $0x260] ss:$12 sps:$4 sm:$0xff]  }
 0x129   :  { %1196 = vmatprep.subr.bf16.mxu1 %v4265_v25  ;;  %v4297_v25 = vld [vmem:[#allocation12 + $0x248] ss:$12 sps:$4 sm:$0xff]  }
 0x12b   :  { %1238 = vmatpush1.bf16.msra.mxu0 %v4266_v28  ;;  %v4300_v28 = vld [vmem:[#allocation12 + $0x1a0] ss:$12 sps:$4 sm:$0xff]  }
 0x12c   :  { %1197 = vmatpush1.bf16.msra.mxu1 %v4263_v26  ;;  %1239 = vmatprep.subr.bf16.mxu0 %v4274_v31  ;;  %v4298_v26 = vld [vmem:[#allocation12 + $0x188] ss:$12 sps:$4 sm:$0xff]   ;;  %v4303_v31 = vld [vmem:[#allocation12 + $0x290] ss:$12 sps:$4 sm:$0xff]  }
 0x12d   :  { %1198 = vmatprep.subr.bf16.mxu1 %v4271_v29  ;;  %v4301_v29 = vld [vmem:[#allocation12 + $0x278] ss:$12 sps:$4 sm:$0xff]  }
 0x12f   :  { %1240 = vmatpush1.bf16.msra.mxu0 %v4272_v32  ;;  %v4304_v32 = vld [vmem:[#allocation12 + $0x1d0] ss:$12 sps:$4 sm:$0xff]  }
 0x130   :  { %1199 = vmatpush1.bf16.msra.mxu1 %v4269_v30  ;;  %1241 = vmatprep.subr.bf16.mxu0 %v4280_v35  ;;  %v4302_v30 = vld [vmem:[#allocation12 + $0x1b8] ss:$12 sps:$4 sm:$0xff]   ;;  %v4307_v35 = vld [vmem:[#allocation12 + $0x2c0] ss:$12 sps:$4 sm:$0xff]  }
 0x131   :  { %1200 = vmatprep.subr.bf16.mxu1 %v4277_v33  ;;  %v4305_v33 = vld [vmem:[#allocation12 + $0x2a8] ss:$12 sps:$4 sm:$0xff]  }
 0x133   :  { %1242 = vmatpush1.bf16.msra.mxu0 %v4278_v36  ;;  %v4308_v36 = vld [vmem:[#allocation12 + $0x200] ss:$12 sps:$4 sm:$0xff]  }
 0x134   :  { %1201 = vmatpush1.bf16.msra.mxu1 %v4275_v34  ;;  %v4306_v34 = vld [vmem:[#allocation12 + $0x1e8] ss:$12 sps:$4 sm:$0xff]  }
 0x135   :  { %4030 = vmatprep.subr.bf16.mxu1 %v4281_v37  ;;  %v4309_v37 = vld [vmem:[#allocation12 + $0x2d8] ss:$12 sps:$4 sm:$0xff]  }
 0x1c9   :  { %v449_v48 = vpop.f32.mrb[0].mxu0 }
 0x1ca   :  { %v450_v50 = vadd.f32 %v449_v48, %v238_v45  ;;  %v451_v51 = vpop.f32.mrb[1].mxu0  ;;  %v490_v54 = vpop.f32.mrb[0].mxu1  ;;  %v4311_v45 = vld [vmem:[#allocation12 + $0x2f0] ss:$12 sps:$4 sm:$0xff]   ;;  %v4313_v48 = vld [vmem:[#allocation15] ss:$8 sps:$4 sm:$0xff]  }
 0x1cb   :  { %v452_v52 = vadd.f32 %v451_v51, %v242_v46  ;;  %v453_v53 = vpop.f32.mrb[2].mxu0  ;;  %v491_v56 = vadd.f32 %v490_v54, %v246_v47  ;;  %v492_v58 = vpop.f32.mrb[1].mxu1  ;;  %v4312_v46 = vld [vmem:[#allocation12 + $0x230] ss:$12 sps:$4 sm:$0xff]  }
 0x1cc   :  { %vm497_vm0 = vcmp.gt.f32.partialorder %v450_v50, 0.0  ;;  %v501_v55 = vmul.f32 0.01, %v450_v50  ;;  %v454_v57 = vpop.f32.mrb[3].mxu0  ;;  %v493_v60 = vadd.f32 %v492_v58, %v250_v49  ;;  %v494_v61 = vpop.f32.mrb[2].mxu1 }
 0x1cd   :  { %vm498_vm1 = vcmp.gt.f32.partialorder %v452_v52, 0.0  ;;  %v502_v59 = vmul.f32 0.01, %v452_v52  ;;  %vm499_vm2 = vcmp.gt.f32.partialorder %v491_v56, 0.0  ;;  %v503_v63 = vmul.f32 0.01, %v491_v56 }
 0x1ce   :  { %v505_v62 = vsel %vm497_vm0, %v450_v50, %v501_v55  ;;  %v495_v0 = vpop.f32.mrb[3].mxu1  ;;  %vm500_vm3 = vcmp.gt.f32.partialorder %v493_v60, 0.0  ;;  %v504_v2 = vmul.f32 0.01, %v493_v60  ;;  %v4315_v47 = vld [vmem:[#allocation15 + $0x4] ss:$8 sps:$4 sm:$0xff]  }
 0x1cf   :  { %v506_v3 = vsel %vm498_vm1, %v452_v52, %v502_v59  ;;  %v507_v4 = vsel %vm499_vm2, %v491_v56, %v503_v63  ;;  %v509_v7 = vpack.c.bf16 %v505_v62, %v505_v62  ;;  %v4318_v49 = vld [vmem:[#allocation15 + $0x14] ss:$8 sps:$4 sm:$0xff]   ;;  %v4316_v50 = vld [vmem:[#allocation15 + $0x10] ss:$8 sps:$4 sm:$0xff]   ;;  %v4321_v51 = vld [vmem:[#allocation15 + $0x24] ss:$8 sps:$4 sm:$0xff]  }
 0x1d0   :  { %v510_v5 = vpack.c.bf16 %v506_v3, %v506_v3  ;;  %v5184_v8 = vpack.c.bf16 %v507_v4, %v507_v4  ;;  %v508_v9 = vsel %vm500_vm3, %v493_v60, %v504_v2  ;;  %v4319_v52 = vld [vmem:[#allocation15 + $0x20] ss:$8 sps:$4 sm:$0xff]   ;;  %v4324_v53 = vld [vmem:[#allocation15 + $0x34] ss:$8 sps:$4 sm:$0xff]   ;;  %v4322_v54 = vld [vmem:[#allocation15 + $0x30] ss:$8 sps:$4 sm:$0xff]  }
 0x1d1   :  { %v512_v10 = vpack.c.bf16 %v508_v9, %v508_v9  ;;  %v4327_v55 = vld [vmem:[#allocation15 + $0x44] ss:$8 sps:$4 sm:$0xff]   ;;  %v4325_v56 = vld [vmem:[#allocation15 + $0x40] ss:$8 sps:$4 sm:$0xff]   ;;  %v4330_v57 = vld [vmem:[#allocation15 + $0x54] ss:$8 sps:$4 sm:$0xff]  }
 0x1d2   :  { %1202 = vmatprep.mubr.bf16.mxu1 %v510_v5  ;;  %v4328_v58 = vld [vmem:[#allocation15 + $0x50] ss:$8 sps:$4 sm:$0xff]   ;;  %v4333_v59 = vld [vmem:[#allocation15 + $0x64] ss:$8 sps:$4 sm:$0xff]   ;;  %v4331_v60 = vld [vmem:[#allocation15 + $0x60] ss:$8 sps:$4 sm:$0xff]  }
 0x1d3   :  { %1203 = vmatmul.mubr.bf16.vlgmr.msra.gmra.mrb[4].mxu1 %v509_v7  ;;  %1243 = vmatprep.mubr.bf16.mxu0 %v512_v10  ;;  %v4336_v61 = vld [vmem:[#allocation15 + $0x74] ss:$8 sps:$4 sm:$0xff]   ;;  %v4334_v62 = vld [vmem:[#allocation15 + $0x70] ss:$8 sps:$4 sm:$0xff]   ;;  %v4339_v63 = vld [vmem:[#allocation15 + $0x84] ss:$8 sps:$4 sm:$0xff]  }
 0x1d4   :  { %4031 = vmatpush3.bf16.msra.mxu1 %v4282_v6  ;;  %1284 = vmatprep.mubr.bf16.mxu1 %v510_v5  ;;  %v4337_v0 = vld [vmem:[#allocation15 + $0x80] ss:$8 sps:$4 sm:$0xff]   ;;  %v4342_v2 = vld [vmem:[#allocation15 + $0x94] ss:$8 sps:$4 sm:$0xff]   ;;  %v4340_v3 = vld [vmem:[#allocation15 + $0x90] ss:$8 sps:$4 sm:$0xff]  }
 0x1d5   :  { %1244 = vmatmul.mubr.bf16.vlgmr.msra.gmra.mrb[4].mxu0 %v5184_v8  ;;  %4032 = vmatprep.subr.bf16.mxu1 %v4283_v11  ;;  %v4345_v4 = vld [vmem:[#allocation15 + $0xa4] ss:$8 sps:$4 sm:$0xff]   ;;  %v4343_v5 = vld [vmem:[#allocation15 + $0xa0] ss:$8 sps:$4 sm:$0xff]   ;;  %v4348_v6 = vld [vmem:[#allocation15 + $0xb4] ss:$8 sps:$4 sm:$0xff]  }
 0x1d6   :  { %1861 = vmatprep.mubr.bf16.mxu0 %v4912_v1  ;;  %v4349_v9 = vld [vmem:[#allocation15 + $0xc0] ss:$8 sps:$4 sm:$0xff]   ;;  %v4352_v11 = vld [vmem:[#allocation15 + $0xd0] ss:$8 sps:$4 sm:$0xff]  }
 0x1d8   :  { %4033 = vmatpush3.bf16.msra.mxu1 %v4284_v12  ;;  %v4357_v12 = vld [vmem:[#allocation15 + $0xe4] ss:$8 sps:$4 sm:$0xff]  }
 0x1d9   :  { %4034 = vmatprep.subr.bf16.mxu1 %v4285_v13  ;;  %v4355_v13 = vld [vmem:[#allocation15 + $0xe0] ss:$8 sps:$4 sm:$0xff]  }
 0x1dc   :  { %4035 = vmatpush3.bf16.msra.mxu1 %v4286_v14  ;;  %v4360_v14 = vld [vmem:[#allocation15 + $0xf4] ss:$8 sps:$4 sm:$0xff]  }
 0x1dd   :  { %4036 = vmatprep.subr.bf16.mxu1 %v4287_v15  ;;  %v4358_v15 = vld [vmem:[#allocation15 + $0xf0] ss:$8 sps:$4 sm:$0xff]  }
 0x1e0   :  { %4037 = vmatpush3.bf16.msra.mxu1 %v4288_v16  ;;  %v4363_v16 = vld [vmem:[#allocation15 + $0x104] ss:$8 sps:$4 sm:$0xff]  }
 0x1e1   :  { %4038 = vmatprep.subr.bf16.mxu1 %v4289_v17  ;;  %v1800_v17 = vld [vmem:[%s5628_s10] sm:$0xff] }
 0x1e4   :  { %4039 = vmatpush3.bf16.msra.mxu1 %v4290_v18  ;;  %v1798_v18 = vld [vmem:[#allocation6] sm:$0xff] }
 0x1e5   :  { %4040 = vmatprep.subr.bf16.mxu1 %v4291_v19  ;;  %v1801_v19 = vld [vmem:[%s5628_s10 + $0x8] sm:$0xff] }
 0x1e8   :  { %4041 = vmatpush3.bf16.msra.mxu1 %v4292_v20  ;;  %v3872_v20 = vcombine.high %v1800_v17, %v1800_v17 }
 0x1e9   :  { %4042 = vmatprep.subr.bf16.mxu1 %v4293_v21  ;;  %v3871_v21 = vcombine.low %v1800_v17, %v1800_v17  ;;  %v4361_v17 = vld [vmem:[#allocation15 + $0x100] ss:$8 sps:$4 sm:$0xff]  }
 0x1ea   :  { %3875 = vmatprep.subr.msk.bf16.mxu0 %vm1816_vm4, %v3872_v20  ;;  %v4467_v20 = vld [vmem:[#allocation18 + $0x1a0] ss:$16 sps:$4 sm:$0xff]  }
 0x1ec   :  { %4043 = vmatpush3.bf16.msra.mxu1 %v4294_v22  ;;  %v3874_v22 = vcombine.high %v1801_v19, %v1801_v19 }
 0x1ed   :  { %4044 = vmatprep.subr.bf16.mxu1 %v4295_v23  ;;  %v3873_v23 = vcombine.low %v1801_v19, %v1801_v19  ;;  %v4366_v19 = vld [vmem:[#allocation15 + $0x114] ss:$8 sps:$4 sm:$0xff]  }
 0x1f0   :  { %4045 = vmatpush3.bf16.msra.mxu1 %v4296_v24  ;;  %v1818_v24 = vsel %vm1816_vm4, %v3871_v21, 0  ;;  %v4364_v21 = vld [vmem:[#allocation15 + $0x110] ss:$8 sps:$4 sm:$0xff]  }
 0x1f1   :  { %4052 = vmatprep.subr.bf16.mxu1 %v4297_v25  ;;  %v1799_v25 = vpack.c.bf16 %v1798_v18, %v1798_v18  ;;  %1830 = vmatpush1.bf16.msra.mxu0 %v1818_v24  ;;  %v4372_v24 = vld [vmem:[#allocation15 + $0x134] ss:$8 sps:$4 sm:$0xff]  }
 0x1f2   :  { %3877 = vmatprep.subr.msk.bf16.mxu0 %vm1816_vm4, %v3874_v22  ;;  %v4369_v22 = vld [vmem:[#allocation15 + $0x124] ss:$8 sps:$4 sm:$0xff]  }
 0x1f3   :  { %1285 = vmatmul.mubr.bf16.vlgmr.msra.gmra.mrb[8].mxu1 %v509_v7  ;;  %v4346_v7 = vld [vmem:[#allocation15 + $0xb0] ss:$8 sps:$4 sm:$0xff]  }
 0x1f4   :  { %4053 = vmatpush3.bf16.msra.mxu1 %v4298_v26  ;;  %1324 = vmatprep.mubr.bf16.mxu1 %v512_v10  ;;  %v4354_v10 = vld [vmem:[#allocation15 + $0xd4] ss:$8 sps:$4 sm:$0xff]   ;;  %v1824_v26 = vsel %vm1816_vm4, %v3873_v23, 0  ;;  %v4367_v23 = vld [vmem:[#allocation15 + $0x120] ss:$8 sps:$4 sm:$0xff]  }
 0x1f5   :  { %4054 = vmatprep.subr.bf16.mxu1 %v4299_v27  ;;  %v4391_v27 = vld [vmem:[#allocation18 + $0x4] ss:$16 sps:$4 sm:$0xff]   ;;  %3876 = vmatmul.mubr.msk.bf16.vlgmr.msra.gmra.mrb[8].mxu0 %vm5639_vm5, %v1799_v25 }
 0x1f6   :  { %1871 = vmatpush1.bf16.msra.mxu0 %v1824_v26  ;;  %1902 = vmatprep.mubr.bf16.mxu0 %v4912_v1  ;;  %v4375_v26 = vld [vmem:[#allocation15 + $0x144] ss:$8 sps:$4 sm:$0xff]  }
 0x1f7   :  { %2231 = vmatprep.subr.bf16.mxu0 %v4391_v27  ;;  %v4373_v27 = vld [vmem:[#allocation15 + $0x140] ss:$8 sps:$4 sm:$0xff]  }
 0x1f8   :  { %4055 = vmatpush3.bf16.msra.mxu1 %v4300_v28  ;;  %v4389_v28 = vld [vmem:[#allocation18] ss:$16 sps:$4 sm:$0xff]  }
 0x1f9   :  { %4056 = vmatprep.subr.bf16.mxu1 %v4301_v29  ;;  %v4397_v29 = vld [vmem:[#allocation18 + $0x24] ss:$16 sps:$4 sm:$0xff]  }
 0x1fc   :  { %4057 = vmatpush3.bf16.msra.mxu1 %v4302_v30  ;;  %v4395_v30 = vld [vmem:[#allocation18 + $0x20] ss:$16 sps:$4 sm:$0xff]  }
 0x1fd   :  { %4058 = vmatprep.subr.bf16.mxu1 %v4303_v31  ;;  %3878 = vmatmul.mubr.msk.bf16.vlgmr.msra.gmra.mrb[12].mxu0 %vm5639_vm5, %v1799_v25  ;;  %v4403_v31 = vld [vmem:[#allocation18 + $0x44] ss:$16 sps:$4 sm:$0xff]  }
 0x1fe   :  { %2232 = vmatpush1.bf16.msra.mxu0 %v4389_v28  ;;  %v4370_v25 = vld [vmem:[#allocation15 + $0x130] ss:$8 sps:$4 sm:$0xff]   ;;  %v4378_v28 = vld [vmem:[#allocation15 + $0x154] ss:$8 sps:$4 sm:$0xff]  }
 0x1ff   :  { %2233 = vmatprep.subr.bf16.mxu0 %v4397_v29  ;;  %v4376_v29 = vld [vmem:[#allocation15 + $0x150] ss:$8 sps:$4 sm:$0xff]  }
 0x200   :  { %4059 = vmatpush3.bf16.msra.mxu1 %v4304_v32  ;;  %v4401_v32 = vld [vmem:[#allocation18 + $0x40] ss:$16 sps:$4 sm:$0xff]  }
 0x201   :  { %4060 = vmatprep.subr.bf16.mxu1 %v4305_v33  ;;  %v4409_v33 = vld [vmem:[#allocation18 + $0x64] ss:$16 sps:$4 sm:$0xff]  }
 0x202   :  { %2234 = vmatpush1.bf16.msra.mxu0 %v4395_v30  ;;  %v4381_v30 = vld [vmem:[#allocation15 + $0x164] ss:$8 sps:$4 sm:$0xff]  }
 0x203   :  { %2235 = vmatprep.subr.bf16.mxu0 %v4403_v31 }
 0x204   :  { %4061 = vmatpush3.bf16.msra.mxu1 %v4306_v34  ;;  %v4407_v34 = vld [vmem:[#allocation18 + $0x60] ss:$16 sps:$4 sm:$0xff]  }
 0x205   :  { %4062 = vmatprep.subr.bf16.mxu1 %v4307_v35  ;;  %v4415_v35 = vld [vmem:[#allocation18 + $0x84] ss:$16 sps:$4 sm:$0xff]  }
 0x206   :  { %2236 = vmatpush1.bf16.msra.mxu0 %v4401_v32 }
 0x207   :  { %2237 = vmatprep.subr.bf16.mxu0 %v4409_v33 }
 0x208   :  { %4063 = vmatpush3.bf16.msra.mxu1 %v4308_v36  ;;  %v4413_v36 = vld [vmem:[#allocation18 + $0x80] ss:$16 sps:$4 sm:$0xff]  }
 0x209   :  { %4064 = vmatprep.subr.bf16.mxu1 %v4309_v37  ;;  %v4421_v37 = vld [vmem:[#allocation18 + $0xa4] ss:$16 sps:$4 sm:$0xff]  }
 0x20a   :  { %2238 = vmatpush1.bf16.msra.mxu0 %v4407_v34  ;;  %v4379_v34 = vld [vmem:[#allocation15 + $0x160] ss:$8 sps:$4 sm:$0xff]  }
 0x20b   :  { %2239 = vmatprep.subr.bf16.mxu0 %v4415_v35 }
 0x20c   :  { %4065 = vmatpush3.bf16.msra.mxu1 %v4310_v41  ;;  %v4419_v41 = vld [vmem:[#allocation18 + $0xa0] ss:$16 sps:$4 sm:$0xff]  }
 0x20d   :  { %4066 = vmatprep.subr.bf16.mxu1 %v4311_v45  ;;  %v4427_v45 = vld [vmem:[#allocation18 + $0xc4] ss:$16 sps:$4 sm:$0xff]  }
 0x20e   :  { %2240 = vmatpush1.bf16.msra.mxu0 %v4413_v36 }
 0x20f   :  { %2241 = vmatprep.subr.bf16.mxu0 %v4421_v37  ;;  %v4384_v37 = vld [vmem:[#allocation15 + $0x174] ss:$8 sps:$4 sm:$0xff]  }
 0x210   :  { %4067 = vmatpush3.bf16.msra.mxu1 %v4312_v46  ;;  %v4425_v46 = vld [vmem:[#allocation18 + $0xc0] ss:$16 sps:$4 sm:$0xff]  }
 0x211   :  { %1644 = vmatprep.subr.bf16.mxu1 %v4315_v47  ;;  %v4433_v47 = vld [vmem:[#allocation18 + $0xe4] ss:$16 sps:$4 sm:$0xff]  }
 0x212   :  { %2242 = vmatpush1.bf16.msra.mxu0 %v4419_v41 }
 0x213   :  { %1325 = vmatmul.mubr.bf16.vlgmr.msra.gmra.mrb[12].mxu1 %v5184_v8  ;;  %v4351_v8 = vld [vmem:[#allocation15 + $0xc4] ss:$8 sps:$4 sm:$0xff]   ;;  %2243 = vmatprep.subr.bf16.mxu0 %v4427_v45 }
 0x214   :  { %1645 = vmatpush1.bf16.msra.mxu1 %v4313_v48  ;;  %v4431_v48 = vld [vmem:[#allocation18 + $0xe0] ss:$16 sps:$4 sm:$0xff]  }
 0x215   :  { %1646 = vmatprep.subr.bf16.mxu1 %v4318_v49  ;;  %v4439_v49 = vld [vmem:[#allocation18 + $0x104] ss:$16 sps:$4 sm:$0xff]  }
 0x216   :  { %2244 = vmatpush1.bf16.msra.mxu0 %v4425_v46  ;;  %v4382_v46 = vld [vmem:[#allocation15 + $0x170] ss:$8 sps:$4 sm:$0xff]  }
 0x217   :  { %2245 = vmatprep.subr.bf16.mxu0 %v4433_v47  ;;  %v4394_v47 = vld [vmem:[#allocation18 + $0xc] ss:$16 sps:$4 sm:$0xff]  }
 0x218   :  { %1647 = vmatpush1.bf16.msra.mxu1 %v4316_v50  ;;  %v4437_v50 = vld [vmem:[#allocation18 + $0x100] ss:$16 sps:$4 sm:$0xff]  }
 0x219   :  { %1648 = vmatprep.subr.bf16.mxu1 %v4321_v51  ;;  %v4445_v51 = vld [vmem:[#allocation18 + $0x124] ss:$16 sps:$4 sm:$0xff]  }
 0x21a   :  { %2246 = vmatpush1.bf16.msra.mxu0 %v4431_v48 }
 0x21b   :  { %2247 = vmatprep.subr.bf16.mxu0 %v4439_v49 }
 0x21c   :  { %1649 = vmatpush1.bf16.msra.mxu1 %v4319_v52  ;;  %v5202_v52 = vld [vmem:[#allocation14] sm:$0x7] }
 0x21d   :  { %1650 = vmatprep.subr.bf16.mxu1 %v4324_v53  ;;  %v4443_v53 = vld [vmem:[#allocation18 + $0x120] ss:$16 sps:$4 sm:$0xff]   ;;  %v654_v32 = vrot.slane %v5202_v52, %v5175_v43 }
 0x21e   :  { %2248 = vmatpush1.bf16.msra.mxu0 %v4437_v50 }
 0x21f   :  { %2249 = vmatprep.subr.bf16.mxu0 %v4445_v51 }
 0x220   :  { %1651 = vmatpush1.bf16.msra.mxu1 %v4322_v54  ;;  %v4451_v54 = vld [vmem:[#allocation18 + $0x144] ss:$16 sps:$4 sm:$0xff]  }
 0x221   :  { %1652 = vmatprep.subr.bf16.mxu1 %v4327_v55  ;;  %v646_v55 = vrot.slane %v5202_v52, %v5169_v40 }
 0x222   :  { %2250 = vmatpush1.bf16.msra.mxu0 %v4443_v53 }
 0x223   :  { %2251 = vmatprep.subr.bf16.mxu0 %v4451_v54 }
 0x224   :  { %1653 = vmatpush1.bf16.msra.mxu1 %v4325_v56  ;;  %v650_v56 = vrot.slane %v5202_v52, %v5172_v42 }
 0x225   :  { %1654 = vmatprep.subr.bf16.mxu1 %v4330_v57  ;;  %v4449_v57 = vld [vmem:[#allocation18 + $0x140] ss:$16 sps:$4 sm:$0xff]  }
 0x226   :  { %2252 = vmatpush1.bf16.msra.mxu0 %v4449_v57 }
 0x228   :  { %1655 = vmatpush1.bf16.msra.mxu1 %v4328_v58 }
 0x229   :  { %1656 = vmatprep.subr.bf16.mxu1 %v4333_v59  ;;  %v4457_v59 = vld [vmem:[#allocation18 + $0x164] ss:$16 sps:$4 sm:$0xff]  }
 0x22a   :  { %2253 = vmatprep.subr.bf16.mxu0 %v4457_v59  ;;  %v4398_v59 = vld [vmem:[#allocation18 + $0x28] ss:$16 sps:$4 sm:$0xff]  }
 0x22c   :  { %1657 = vmatpush1.bf16.msra.mxu1 %v4331_v60 }
 0x22d   :  { %1658 = vmatprep.subr.bf16.mxu1 %v4336_v61 }
 0x230   :  { %1659 = vmatpush1.bf16.msra.mxu1 %v4334_v62 }
 0x231   :  { %1660 = vmatprep.subr.bf16.mxu1 %v4339_v63 }
 0x234   :  { %1661 = vmatpush1.bf16.msra.mxu1 %v4337_v0 }
 0x235   :  { %1662 = vmatprep.subr.bf16.mxu1 %v4342_v2 }
 0x238   :  { %1663 = vmatpush1.bf16.msra.mxu1 %v4340_v3 }
 0x239   :  { %1664 = vmatprep.subr.bf16.mxu1 %v4345_v4 }
 0x23c   :  { %1665 = vmatpush1.bf16.msra.mxu1 %v4343_v5  ;;  %v4455_v5 = vld [vmem:[#allocation18 + $0x160] ss:$16 sps:$4 sm:$0xff]  }
 0x23d   :  { %1666 = vmatprep.subr.bf16.mxu1 %v4348_v6  ;;  %2254 = vmatpush1.bf16.msra.mxu0 %v4455_v5  ;;  %v4430_v5 = vld [vmem:[#allocation18 + $0xcc] ss:$16 sps:$4 sm:$0xff]  }
 0x240   :  { %1667 = vmatpush1.bf16.msra.mxu1 %v4346_v7 }
 0x241   :  { %1668 = vmatprep.subr.bf16.mxu1 %v4351_v8  ;;  %v4463_v8 = vld [vmem:[#allocation18 + $0x184] ss:$16 sps:$4 sm:$0xff]  }
 0x242   :  { %2255 = vmatprep.subr.bf16.mxu0 %v4463_v8  ;;  %v4434_v8 = vld [vmem:[#allocation18 + $0xe8] ss:$16 sps:$4 sm:$0xff]  }
 0x244   :  { %1669 = vmatpush1.bf16.msra.mxu1 %v4349_v9 }
 0x245   :  { %1670 = vmatprep.subr.bf16.mxu1 %v4354_v10 }
 0x248   :  { %1671 = vmatpush1.bf16.msra.mxu1 %v4352_v11 }
 0x249   :  { %1672 = vmatprep.subr.bf16.mxu1 %v4357_v12 }
 0x24c   :  { %1673 = vmatpush1.bf16.msra.mxu1 %v4355_v13  ;;  %v4461_v13 = vld [vmem:[#allocation18 + $0x180] ss:$16 sps:$4 sm:$0xff]  }
 0x24d   :  { %1674 = vmatprep.subr.bf16.mxu1 %v4360_v14  ;;  %2256 = vmatpush1.bf16.msra.mxu0 %v4461_v13  ;;  %v4454_v13 = vld [vmem:[#allocation18 + $0x14c] ss:$16 sps:$4 sm:$0xff]  }
 0x250   :  { %1675 = vmatpush1.bf16.msra.mxu1 %v4358_v15  ;;  %v4469_v15 = vld [vmem:[#allocation18 + $0x1a4] ss:$16 sps:$4 sm:$0xff]  }
 0x251   :  { %1685 = vmatprep.subr.bf16.mxu1 %v4363_v16  ;;  %2257 = vmatprep.subr.bf16.mxu0 %v4469_v15  ;;  %v4460_v15 = vld [vmem:[#allocation18 + $0x16c] ss:$16 sps:$4 sm:$0xff]  }
 0x252   :  { %2258 = vmatpush1.bf16.msra.mxu0 %v4467_v20  ;;  %v4470_v20 = vld [vmem:[#allocation18 + $0x1a8] ss:$16 sps:$4 sm:$0xff]  }
 0x2a6   :  { %v1204_v58 = vpop.f32.mrb[4].mxu1 }
 0x2a7   :  { %v1205_v60 = vadd.f32 %v1204_v58, %v646_v55  ;;  %v1206_v61 = vpop.f32.mrb[5].mxu1  ;;  %v4400_v58 = vld [vmem:[#allocation18 + $0x2c] ss:$16 sps:$4 sm:$0xff]  }
 0x2a8   :  { %v1207_v62 = vadd.f32 %v1206_v61, %v650_v56  ;;  %v1208_v63 = vpop.f32.mrb[6].mxu1  ;;  %v1245_v0 = vpop.f32.mrb[4].mxu0  ;;  %v4392_v56 = vld [vmem:[#allocation18 + $0x8] ss:$16 sps:$4 sm:$0xff]  }
 0x2a9   :  { %v1246_v2 = vadd.f32 %v1245_v0, %v1205_v60  ;;  %v1209_v3 = vpop.f32.mrb[7].mxu1  ;;  %v1247_v4 = vpop.f32.mrb[5].mxu0  ;;  %v4406_v60 = vld [vmem:[#allocation18 + $0x4c] ss:$16 sps:$4 sm:$0xff]   ;;  %v4404_v61 = vld [vmem:[#allocation18 + $0x48] ss:$16 sps:$4 sm:$0xff]  }
 0x2aa   :  { %v1248_v6 = vadd.f32 %v1247_v4, %v1207_v62  ;;  %v1249_v7 = vpop.f32.mrb[6].mxu0  ;;  %v4412_v62 = vld [vmem:[#allocation18 + $0x6c] ss:$16 sps:$4 sm:$0xff]   ;;  %v4410_v63 = vld [vmem:[#allocation18 + $0x68] ss:$16 sps:$4 sm:$0xff]  }
 0x2ab   :  { %vm1332_vm6 = vcmp.gt.f32.partialorder %v1246_v2, 0.0  ;;  %v1335_v9 = vmul.f32 0.01, %v1246_v2  ;;  %v1250_v10 = vpop.f32.mrb[7].mxu0  ;;  %v4418_v0 = vld [vmem:[#allocation18 + $0x8c] ss:$16 sps:$4 sm:$0xff]  }
 0x2ac   :  { %vm1333_vm7 = vcmp.gt.f32.partialorder %v1248_v6, 0.0  ;;  %v1336_v11 = vmul.f32 0.01, %v1248_v6  ;;  %v4424_v3 = vld [vmem:[#allocation18 + $0xac] ss:$16 sps:$4 sm:$0xff]  }
 0x2ad   :  { %v1338_v12 = vsel %vm1332_vm6, %v1246_v2, %v1335_v9  ;;  %v4416_v2 = vld [vmem:[#allocation18 + $0x88] ss:$16 sps:$4 sm:$0xff]   ;;  %v4436_v7 = vld [vmem:[#allocation18 + $0xec] ss:$16 sps:$4 sm:$0xff]  }
 0x2ae   :  { %v1339_v14 = vsel %vm1333_vm7, %v1248_v6, %v1336_v11  ;;  %v1341_v18 = vpack.c.bf16 %v1338_v12, %v1338_v12  ;;  %v4422_v4 = vld [vmem:[#allocation18 + $0xa8] ss:$16 sps:$4 sm:$0xff]   ;;  %v4442_v9 = vld [vmem:[#allocation18 + $0x10c] ss:$16 sps:$4 sm:$0xff]  }
 0x2af   :  { %v1342_v16 = vpack.c.bf16 %v1339_v14, %v1339_v14  ;;  %v4428_v6 = vld [vmem:[#allocation18 + $0xc8] ss:$16 sps:$4 sm:$0xff]   ;;  %v4448_v11 = vld [vmem:[#allocation18 + $0x12c] ss:$16 sps:$4 sm:$0xff]  }
 0x2b0   :  { %v4440_v10 = vld [vmem:[#allocation18 + $0x108] ss:$16 sps:$4 sm:$0xff]  }
 0x2b1   :  { %1676 = vmatprep.mubr.bf16.mxu1 %v1342_v16  ;;  %v4446_v12 = vld [vmem:[#allocation18 + $0x128] ss:$16 sps:$4 sm:$0xff]  }
 0x2b2   :  { %1677 = vmatmul.mubr.bf16.vlgmr.msra.gmra.mrb[16].mxu1 %v1341_v18  ;;  %v4452_v14 = vld [vmem:[#allocation18 + $0x148] ss:$16 sps:$4 sm:$0xff]  }
 0x2b3   :  { %1686 = vmatpush1.bf16.msra.mxu1 %v4361_v17  ;;  %1717 = vmatprep.mubr.bf16.mxu1 %v4912_v1  ;;  %v4458_v16 = vld [vmem:[#allocation18 + $0x168] ss:$16 sps:$4 sm:$0xff]   ;;  %v4466_v17 = vld [vmem:[#allocation18 + $0x18c] ss:$16 sps:$4 sm:$0xff]  }
 0x2b4   :  { %1687 = vmatprep.subr.bf16.mxu1 %v4366_v19  ;;  %v4464_v18 = vld [vmem:[#allocation18 + $0x188] ss:$16 sps:$4 sm:$0xff]   ;;  %v4472_v19 = vld [vmem:[#allocation18 + $0x1ac] ss:$16 sps:$4 sm:$0xff]  }
 0x2b7   :  { %1688 = vmatpush1.bf16.msra.mxu1 %v4364_v21  ;;  %v4475_v21 = vld [vmem:[#allocation18 + $0x1c4] ss:$16 sps:$4 sm:$0xff]  }
 0x2b8   :  { %1689 = vmatprep.subr.bf16.mxu1 %v4369_v22  ;;  %v4478_v22 = vld [vmem:[#allocation18 + $0x1cc] ss:$16 sps:$4 sm:$0xff]   ;;  %2259 = vmatprep.subr.bf16.mxu0 %v4475_v21  ;;  %v4501_v21 = vld [vmem:[#allocation20 + $0x40] ss:$8 sps:$4 sm:$0xff]  }
 0x2bb   :  { %1690 = vmatpush1.bf16.msra.mxu1 %v4367_v23  ;;  %v4473_v23 = vld [vmem:[#allocation18 + $0x1c0] ss:$16 sps:$4 sm:$0xff]  }
 0x2bc   :  { %1691 = vmatprep.subr.bf16.mxu1 %v4372_v24  ;;  %v4476_v24 = vld [vmem:[#allocation18 + $0x1c8] ss:$16 sps:$4 sm:$0xff]   ;;  %2260 = vmatpush1.bf16.msra.mxu0 %v4473_v23 }
 0x2bd   :  { %v2345_v23 = vld [vmem:[#allocation8 + $0x30] sm:$0xff] }
 0x2bf   :  { %1692 = vmatpush1.bf16.msra.mxu1 %v4370_v25  ;;  %v4481_v25 = vld [vmem:[#allocation18 + $0x1e4] ss:$16 sps:$4 sm:$0xff]  }
 0x2c0   :  { %1693 = vmatprep.subr.bf16.mxu1 %v4375_v26  ;;  %v4484_v26 = vld [vmem:[#allocation18 + $0x1ec] ss:$16 sps:$4 sm:$0xff]   ;;  %2261 = vmatprep.subr.bf16.mxu0 %v4481_v25  ;;  %v4504_v25 = vld [vmem:[#allocation20 + $0x50] ss:$8 sps:$4 sm:$0xff]  }
 0x2c3   :  { %1694 = vmatpush1.bf16.msra.mxu1 %v4373_v27  ;;  %v4479_v27 = vld [vmem:[#allocation18 + $0x1e0] ss:$16 sps:$4 sm:$0xff]  }
 0x2c4   :  { %1695 = vmatprep.subr.bf16.mxu1 %v4378_v28  ;;  %v4482_v28 = vld [vmem:[#allocation18 + $0x1e8] ss:$16 sps:$4 sm:$0xff]   ;;  %2262 = vmatpush1.bf16.msra.mxu0 %v4479_v27 }
 0x2c6   :  { %v4046_v31 = vpop.f32.mrb[8].mxu1 }
 0x2c7   :  { %v4047_v33 = vpop.f32.mrb[9].mxu1  ;;  %1696 = vmatpush1.bf16.msra.mxu1 %v4376_v29  ;;  %v2351_v29 = vld [vmem:[%s5629_s11] sm:$0xff] }
 0x2c8   :  { %v4048_v35 = vadd.f32 %v4047_v33, %v4046_v31  ;;  %v4049_v36 = vpop.f32.mrb[10].mxu1  ;;  %1697 = vmatprep.subr.bf16.mxu1 %v4381_v30  ;;  %v3944_v30 = vcombine.high %v2351_v29, %v2351_v29  ;;  %v2352_v31 = vld [vmem:[%s5629_s11 + $0x8] sm:$0xff]  ;;  %v5219_v33 = vpop.f32.mrb[8].mxu0 }
 0x2c9   :  { %v4050_v41 = vpop.f32.mrb[11].mxu1 }
 0x2ca   :  { %v1287_v45 = vadd.f32 %v4048_v35, %v654_v32  ;;  %v3946_v32 = vcombine.high %v2352_v31, %v2352_v31  ;;  %3947 = vmatprep.subr.msk.bf16.mxu0 %vm1816_vm4, %v3944_v30  ;;  %v4510_v30 = vld [vmem:[#allocation20 + $0x70] ss:$8 sps:$4 sm:$0xff]  }
 0x2cb   :  { %1698 = vmatpush1.bf16.msra.mxu1 %v4379_v34  ;;  %v5221_v34 = vpop.f32.mrb[9].mxu0 }
 0x2cc   :  { %1699 = vmatprep.subr.bf16.mxu1 %v4384_v37  ;;  %v1867_v35 = vpop.f32.mrb[10].mxu0 }
 0x2cd   :  { %v1868_v36 = vpop.f32.mrb[11].mxu0  ;;  %v4516_v35 = vld [vmem:[#allocation20 + $0x90] ss:$8 sps:$4 sm:$0xff]  }
 0x2ce   :  { %v4521_v36 = vld [vmem:[#allocation20 + $0xa4] ss:$8 sps:$4 sm:$0xff]  }
 0x2cf   :  { %1700 = vmatpush1.bf16.msra.mxu1 %v4382_v46 }
 0x2d0   :  { %2272 = vmatprep.subr.bf16.mxu1 %v4394_v47  ;;  %v5223_v37 = vpop.f32.mrb[12].mxu0  ;;  %v1392_v47 = vld [vmem:[#allocation17] sm:$0x3] }
 0x2d1   :  { %v5225_v41 = vpop.f32.mrb[13].mxu0 }
 0x2e6   :  { %v4068_v48 = vpop.f32.mrb[12].mxu1 }
 0x2e7   :  { %v4069_v49 = vpop.f32.mrb[13].mxu1 }
 0x2e8   :  { %v4070_v50 = vadd.f32 %v4069_v49, %v4068_v48  ;;  %v4071_v51 = vpop.f32.mrb[14].mxu1  ;;  %v1397_v48 = vrot.slane %v1392_v47, %v5169_v40  ;;  %v1401_v49 = vrot.slane %v1392_v47, %v5172_v42  ;;  %v4522_v47 = vld [vmem:[#allocation20 + $0xb0] ss:$8 sps:$4 sm:$0xff]  }
 0x2e9   :  { %v4072_v52 = vpop.f32.mrb[15].mxu1 }
 0x2ea   :  { %v1327_v53 = vadd.f32 %v4070_v50, %v1287_v45  ;;  %v1908_v45 = vpop.f32.mrb[14].mxu0 }
 0x2eb   :  { %v1909_v46 = vpop.f32.mrb[15].mxu0  ;;  %v4519_v45 = vld [vmem:[#allocation20 + $0xa0] ss:$8 sps:$4 sm:$0xff]  }
 0x2ec   :  { %vm1334_vm8 = vcmp.gt.f32.partialorder %v1327_v53, 0.0  ;;  %v1337_v54 = vmul.f32 0.01, %v1327_v53  ;;  %v4524_v46 = vld [vmem:[#allocation20 + $0xb4] ss:$8 sps:$4 sm:$0xff]  }
 0x2ee   :  { %v1340_v55 = vsel %vm1334_vm8, %v1327_v53, %v1337_v54 }
 0x2ef   :  { %v1343_v57 = vpack.c.bf16 %v1340_v55, %v1340_v55 }
 0x2f1   :  { %1718 = vmatmul.mubr.bf16.vlgmr.msra.gmra.mrb[16].mxu1 %v1343_v57 }
 0x2f2   :  { %2273 = vmatpush1.bf16.msra.mxu1 %v4392_v56 }
 0x2f3   :  { %2274 = vmatprep.subr.bf16.mxu1 %v4400_v58  ;;  %v3943_v58 = vcombine.low %v2351_v29, %v2351_v29  ;;  %v4512_v29 = vld [vmem:[#allocation20 + $0x74] ss:$8 sps:$4 sm:$0xff]  }
 0x2f6   :  { %2275 = vmatpush1.bf16.msra.mxu1 %v4398_v59  ;;  %v3945_v59 = vcombine.low %v2352_v31, %v2352_v31  ;;  %v4515_v31 = vld [vmem:[#allocation20 + $0x84] ss:$8 sps:$4 sm:$0xff]  }
 0x2f7   :  { %2276 = vmatprep.subr.bf16.mxu1 %v4406_v60 }
 0x2fa   :  { %2277 = vmatpush1.bf16.msra.mxu1 %v4404_v61 }
 0x2fb   :  { %2278 = vmatprep.subr.bf16.mxu1 %v4412_v62 }
 0x2fe   :  { %2279 = vmatpush1.bf16.msra.mxu1 %v4410_v63 }
 0x2ff   :  { %2280 = vmatprep.subr.bf16.mxu1 %v4418_v0  ;;  %v2376_v0 = vsel %vm1816_vm4, %v3943_v58, 0  ;;  %v4913_v58 = vmov 1966171168  }
 0x302   :  { %2281 = vmatpush1.bf16.msra.mxu1 %v4416_v2  ;;  %v2382_v2 = vsel %vm1816_vm4, %v3945_v59, 0  ;;  %v2542_v59 = vunpack.c.l.s4 %v4913_v58 }
 0x303   :  { %2282 = vmatprep.subr.bf16.mxu1 %v4424_v3  ;;  %v4491_v3 = vld [vmem:[#allocation20 + $0x4] ss:$8 sps:$4 sm:$0xff]  }
 0x306   :  { %2283 = vmatpush1.bf16.msra.mxu1 %v4422_v4  ;;  %v2339_v4 = vld [vmem:[#allocation8] sm:$0xff] }
 0x307   :  { %2284 = vmatprep.subr.bf16.mxu1 %v4430_v5  ;;  %v2340_v5 = vld [vmem:[#allocation8 + $0x8] sm:$0xff] }
 0x30a   :  { %2285 = vmatpush1.bf16.msra.mxu1 %v4428_v6  ;;  %v2347_v6 = vpack.c.bf16 %v2340_v5, %v2339_v4 }
 0x30b   :  { %2286 = vmatprep.subr.bf16.mxu1 %v4436_v7  ;;  %v4489_v7 = vld [vmem:[#allocation20] ss:$8 sps:$4 sm:$0xff]  }
 0x30e   :  { %2287 = vmatpush1.bf16.msra.mxu1 %v4434_v8  ;;  %v4494_v8 = vld [vmem:[#allocation20 + $0x14] ss:$8 sps:$4 sm:$0xff]  }
 0x30f   :  { %2288 = vmatprep.subr.bf16.mxu1 %v4442_v9  ;;  %v2341_v9 = vld [vmem:[#allocation8 + $0x10] sm:$0xff] }
 0x312   :  { %2289 = vmatpush1.bf16.msra.mxu1 %v4440_v10  ;;  %v2342_v10 = vld [vmem:[#allocation8 + $0x18] sm:$0xff] }
 0x313   :  { %2290 = vmatprep.subr.bf16.mxu1 %v4448_v11  ;;  %v4492_v11 = vld [vmem:[#allocation20 + $0x10] ss:$8 sps:$4 sm:$0xff]  }
 0x316   :  { %2291 = vmatpush1.bf16.msra.mxu1 %v4446_v12  ;;  %v4497_v12 = vld [vmem:[#allocation20 + $0x24] ss:$8 sps:$4 sm:$0xff]  }
 0x317   :  { %2292 = vmatprep.subr.bf16.mxu1 %v4454_v13  ;;  %v2348_v13 = vpack.c.bf16 %v2342_v10, %v2341_v9 }
 0x31a   :  { %2293 = vmatpush1.bf16.msra.mxu1 %v4452_v14  ;;  %v4495_v14 = vld [vmem:[#allocation20 + $0x20] ss:$8 sps:$4 sm:$0xff]  }
 0x31b   :  { %2294 = vmatprep.subr.bf16.mxu1 %v4460_v15  ;;  %v4500_v15 = vld [vmem:[#allocation20 + $0x34] ss:$8 sps:$4 sm:$0xff]  }
 0x31e   :  { %2295 = vmatpush1.bf16.msra.mxu1 %v4458_v16  ;;  %v2343_v16 = vld [vmem:[#allocation8 + $0x20] sm:$0xff] }
 0x31f   :  { %2296 = vmatprep.subr.bf16.mxu1 %v4466_v17  ;;  %v2344_v17 = vld [vmem:[#allocation8 + $0x28] sm:$0xff] }
 0x322   :  { %2297 = vmatpush1.bf16.msra.mxu1 %v4464_v18  ;;  %v4498_v18 = vld [vmem:[#allocation20 + $0x30] ss:$8 sps:$4 sm:$0xff]  }
 0x323   :  { %2298 = vmatprep.subr.bf16.mxu1 %v4472_v19  ;;  %v4503_v19 = vld [vmem:[#allocation20 + $0x44] ss:$8 sps:$4 sm:$0xff]  }
 0x326   :  { %2299 = vmatpush1.bf16.msra.mxu1 %v4470_v20  ;;  %v2349_v20 = vpack.c.bf16 %v2344_v17, %v2343_v16 }
 0x327   :  { %2300 = vmatprep.subr.bf16.mxu1 %v4478_v22  ;;  %v4506_v22 = vld [vmem:[#allocation20 + $0x54] ss:$8 sps:$4 sm:$0xff]  }
 0x32a   :  { %2301 = vmatpush1.bf16.msra.mxu1 %v4476_v24  ;;  %v2346_v24 = vld [vmem:[#allocation8 + $0x38] sm:$0xff] }
 0x32b   :  { %2302 = vmatprep.subr.bf16.mxu1 %v4484_v26  ;;  %v4509_v26 = vld [vmem:[#allocation20 + $0x64] ss:$8 sps:$4 sm:$0xff]   ;;  %v2350_v27 = vpack.c.bf16 %v2346_v24, %v2345_v23 }
 0x32e   :  { %2303 = vmatpush1.bf16.msra.mxu1 %v4482_v28  ;;  %v4507_v28 = vld [vmem:[#allocation20 + $0x60] ss:$8 sps:$4 sm:$0xff]  }
 0x32f   :  { %3952 = vmatprep.subr.msk.bf16.mxu1 %vm1816_vm4, %v3946_v32  ;;  %v4518_v32 = vld [vmem:[#allocation20 + $0x94] ss:$8 sps:$4 sm:$0xff]  }
 0x3c4   :  { %v1719_v50 = vpop.f32.mrb[16].mxu1 }
 0x3c5   :  { %v4078_v51 = vadd.f32 %v1719_v50, %v1397_v48  ;;  %v1721_v52 = vpop.f32.mrb[17].mxu1  ;;  %v4527_v48 = vld [vmem:[#allocation20 + $0xc4] ss:$8 sps:$4 sm:$0xff]   ;;  %v4530_v50 = vld [vmem:[#allocation20 + $0xd4] ss:$8 sps:$4 sm:$0xff]  }
 0x3c6   :  { %v4079_v53 = vadd.f32 %v1721_v52, %v1401_v49  ;;  %v1723_v54 = vpop.f32.mrb[18].mxu1  ;;  %v4525_v49 = vld [vmem:[#allocation20 + $0xc0] ss:$8 sps:$4 sm:$0xff]   ;;  %v4533_v52 = vld [vmem:[#allocation20 + $0xe4] ss:$8 sps:$4 sm:$0xff]  }
 0x3c7   :  { %vm1726_vm9 = vcmp.gt.f32.partialorder %v4078_v51, 0.0  ;;  %v1728_v55 = vmul.f32 0.01, %v4078_v51  ;;  %v1724_v56 = vpop.f32.mrb[19].mxu1  ;;  %v4536_v54 = vld [vmem:[#allocation20 + $0xf4] ss:$8 sps:$4 sm:$0xff]  }
 0x3c8   :  { %vm1727_vm10 = vcmp.gt.f32.partialorder %v4079_v53, 0.0  ;;  %v1729_v57 = vmul.f32 0.01, %v4079_v53  ;;  %v4539_v56 = vld [vmem:[#allocation20 + $0x104] ss:$8 sps:$4 sm:$0xff]  }
 0x3c9   :  { %v1730_v60 = vsel %vm1726_vm9, %v4078_v51, %v1728_v55  ;;  %v4528_v51 = vld [vmem:[#allocation20 + $0xd0] ss:$8 sps:$4 sm:$0xff]  }
 0x3ca   :  { %v1731_v61 = vsel %vm1727_vm10, %v4079_v53, %v1729_v57  ;;  %v1732_v63 = vpack.c.bf16 %v1730_v60, %v1730_v60  ;;  %v4531_v53 = vld [vmem:[#allocation20 + $0xe0] ss:$8 sps:$4 sm:$0xff]   ;;  %v4534_v55 = vld [vmem:[#allocation20 + $0xf0] ss:$8 sps:$4 sm:$0xff]  }
 0x3cb   :  { %v1733_v62 = vpack.c.bf16 %v1731_v61, %v1731_v61  ;;  %v2313_v57 = vld [vmem:[%s5630_s12] sm:$0xf] }
 0x3cc   :  { %v2318_v60 = vrot.slane %v2313_v57, %v5169_v40  ;;  %v2326_v61 = vrot.slane %v2313_v57, %v5175_v43 }
 0x3cd   :  { %2263 = vmatprep.mubr.bf16.mxu0 %v1733_v62  ;;  %2304 = vmatprep.mubr.bf16.mxu1 %v1733_v62 }
 0x3ce   :  { %2264 = vmatmul.mubr.bf16.vlgmr.msra.gmra.mrb[16].mxu0 %v1732_v63  ;;  %2305 = vmatmul.mubr.bf16.vlgmr.msra.gmra.mrb[20].mxu1 %v1732_v63 }
 0x3cf   :  { %2388 = vmatpush1.bf16.msra.mxu0 %v2376_v0  ;;  %2461 = vmatpush1.bf16.msra.mxu1 %v2382_v2  ;;  %v2322_v0 = vrot.slane %v2313_v57, %v5172_v42  ;;  %v2543_v2 = vunpack.c.0.s8 %v2542_v59 }
 0x3d0   :  { %2419 = vmatprep.mubr.bf16.mxu0 %v4912_v1  ;;  %2492 = vmatprep.mubr.bf16.mxu1 %v4912_v1 }
 0x3d1   :  { %3305 = vmatprep.subr.bf16.mxu0 %v4491_v3  ;;  %v2330_v3 = vrot.slane %v2313_v57, %v5178_v44  ;;  %v5259_v17 = vsub.s32 %v2543_v2, %v5166_v39 }
 0x3d6   :  { %3948 = vmatmul.mubr.msk.bf16.vlgmr.msra.gmra.mrb[20].mxu0 %vm5639_vm5, %v2347_v6  ;;  %3953 = vmatmul.mubr.msk.bf16.vlgmr.msra.gmra.mrb[24].mxu1 %vm5639_vm5, %v2347_v6 }
 0x3d7   :  { %2429 = vmatprep.mubr.bf16.mxu0 %v4912_v1  ;;  %2502 = vmatprep.mubr.bf16.mxu1 %v4912_v1 }
 0x3d8   :  { %3306 = vmatpush1.bf16.msra.mxu0 %v4489_v7 }
 0x3d9   :  { %3307 = vmatprep.subr.bf16.mxu0 %v4494_v8 }
 0x3dc   :  { %3308 = vmatpush1.bf16.msra.mxu0 %v4492_v11 }
 0x3dd   :  { %3309 = vmatprep.subr.bf16.mxu0 %v4497_v12 }
 0x3de   :  { %3949 = vmatmul.mubr.msk.bf16.gmra.mrb[24].mxu0 %vm5639_vm5, %v2348_v13  ;;  %3954 = vmatmul.mubr.msk.bf16.gmra.mrb[28].mxu1 %vm5639_vm5, %v2348_v13 }
 0x3df   :  { %2439 = vmatprep.mubr.bf16.mxu0 %v4912_v1  ;;  %2512 = vmatprep.mubr.bf16.mxu1 %v4912_v1 }
 0x3e0   :  { %3310 = vmatpush1.bf16.msra.mxu0 %v4495_v14 }
 0x3e1   :  { %3311 = vmatprep.subr.bf16.mxu0 %v4500_v15 }
 0x3e4   :  { %3312 = vmatpush1.bf16.msra.mxu0 %v4498_v18 }
 0x3e5   :  { %3313 = vmatprep.subr.bf16.mxu0 %v4503_v19 }
 0x3e6   :  { %3950 = vmatmul.mubr.msk.bf16.gmra.mrb[28].mxu0 %vm5639_vm5, %v2349_v20  ;;  %3955 = vmatmul.mubr.msk.bf16.gmra.mrb[32].mxu1 %vm5639_vm5, %v2349_v20 }
 0x3e7   :  { %2449 = vmatprep.mubr.bf16.mxu0 %v4912_v1  ;;  %2522 = vmatprep.mubr.bf16.mxu1 %v4912_v1  ;;  %v4513_v1 = vld [vmem:[#allocation20 + $0x80] ss:$8 sps:$4 sm:$0xff]  }
 0x3e8   :  { %3314 = vmatpush1.bf16.msra.mxu0 %v4501_v21 }
 0x3e9   :  { %3315 = vmatprep.subr.bf16.mxu0 %v4506_v22 }
 0x3ec   :  { %3316 = vmatpush1.bf16.msra.mxu0 %v4504_v25 }
 0x3ed   :  { %3317 = vmatprep.subr.bf16.mxu0 %v4509_v26 }
 0x3ee   :  { %3951 = vmatmul.mubr.msk.bf16.gmra.mrb[32].mxu0 %vm5639_vm5, %v2350_v27  ;;  %3956 = vmatmul.mubr.msk.bf16.gmra.mrb[36].mxu1 %vm5639_vm5, %v2350_v27 }
 0x3f0   :  { %3318 = vmatpush1.bf16.msra.mxu0 %v4507_v28 }
 0x3f1   :  { %3319 = vmatprep.subr.bf16.mxu0 %v4512_v29 }
 0x3f4   :  { %3320 = vmatpush1.bf16.msra.mxu0 %v4510_v30 }
 0x3f5   :  { %3321 = vmatprep.subr.bf16.mxu0 %v4515_v31 }
 0x3f8   :  { %3322 = vmatpush1.bf16.msra.mxu0 %v4513_v1 }
 0x3f9   :  { %3323 = vmatprep.subr.bf16.mxu0 %v4518_v32 }
 0x3fc   :  { %3324 = vmatpush1.bf16.msra.mxu0 %v4516_v35 }
 0x3fd   :  { %3325 = vmatprep.subr.bf16.mxu0 %v4521_v36 }
 0x400   :  { %3326 = vmatpush1.bf16.msra.mxu0 %v4519_v45 }
 0x401   :  { %3327 = vmatprep.subr.bf16.mxu0 %v4524_v46 }
 0x404   :  { %3328 = vmatpush1.bf16.msra.mxu0 %v4522_v47 }
 0x405   :  { %3329 = vmatprep.subr.bf16.mxu0 %v4527_v48 }
 0x408   :  { %3330 = vmatpush1.bf16.msra.mxu0 %v4525_v49 }
 0x409   :  { %3331 = vmatprep.subr.bf16.mxu0 %v4530_v50 }
 0x40c   :  { %3332 = vmatpush1.bf16.msra.mxu0 %v4528_v51 }
 0x40d   :  { %3333 = vmatprep.subr.bf16.mxu0 %v4533_v52 }
 0x410   :  { %3334 = vmatpush1.bf16.msra.mxu0 %v4531_v53 }
 0x411   :  { %3335 = vmatprep.subr.bf16.mxu0 %v4536_v54 }
 0x414   :  { %3336 = vmatpush1.bf16.msra.mxu0 %v4534_v55 }
 0x415   :  { %3378 = vmatprep.subr.bf16.mxu0 %v4539_v56 }
 0x4a1   :  { %v2265_v62 = vpop.f32.mrb[16].mxu0  ;;  %v2306_v63 = vpop.f32.mrb[20].mxu1 }
 0x4a2   :  { %v2266_v4 = vadd.f32 %v2265_v62, %v5219_v33  ;;  %v2307_v5 = vadd.f32 %v2306_v63, %v5223_v37  ;;  %v2267_v6 = vpop.f32.mrb[17].mxu0  ;;  %v2308_v7 = vpop.f32.mrb[21].mxu1 }
 0x4a3   :  { %v2268_v8 = vadd.f32 %v2267_v6, %v5221_v34  ;;  %v2309_v9 = vadd.f32 %v2308_v7, %v5225_v41  ;;  %v2269_v10 = vpop.f32.mrb[18].mxu0  ;;  %v2310_v11 = vpop.f32.mrb[22].mxu1 }
 0x4a4   :  { %v2335_v12 = vadd.f32 %v2318_v60, %v2266_v4  ;;  %v2337_v13 = vadd.f32 %v2326_v61, %v2307_v5  ;;  %v2270_v14 = vpop.f32.mrb[19].mxu0  ;;  %v2311_v15 = vpop.f32.mrb[23].mxu1 }
 0x4a5   :  { %v2336_v16 = vadd.f32 %v2322_v0, %v2268_v8  ;;  %v2338_v18 = vadd.f32 %v2330_v3, %v2309_v9 }
 0x4a7   :  { %v2537_v33 = vcombine.low %v2335_v12, %v2336_v16  ;;  %v2538_v19 = vcombine.high %v2335_v12, %v2336_v16  ;;  %v2539_v37 = vcombine.low %v2337_v13, %v2338_v18  ;;  %v2540_v20 = vcombine.high %v2337_v13, %v2338_v18 }
 0x4a9   :  { %v2547_v21 = vrot.slane %v2537_v33, %v5259_v17  ;;  %v5263_v34 = vrot.slane %v2538_v19, %v5259_v17  ;;  %v2561_v41 = vrot.slane %v2539_v37, %v5259_v17  ;;  %v5267_v22 = vrot.slane %v2540_v20, %v5259_v17  ;;  %v2421_v23 = vpop.f32.mrb[20].mxu0  ;;  %v2494_v24 = vpop.f32.mrb[24].mxu1 }
 0x4aa   :  { %v2423_v25 = vpop.f32.mrb[21].mxu0  ;;  %v2496_v26 = vpop.f32.mrb[25].mxu1 }
 0x4ab   :  { %v2569_v27 = vcombine.low %v2547_v21, %v2561_v41  ;;  %v2570_v28 = vcombine.high %v2547_v21, %v2561_v41  ;;  %v2571_v29 = vcombine.low %v5263_v34, %v5267_v22  ;;  %v2572_v30 = vcombine.high %v5263_v34, %v5267_v22  ;;  %v2425_v31 = vpop.f32.mrb[22].mxu0  ;;  %v2498_v1 = vpop.f32.mrb[26].mxu1 }
 0x4ac   :  { %v2427_v32 = vpop.f32.mrb[23].mxu0  ;;  %v2500_v35 = vpop.f32.mrb[27].mxu1 }
 0x4ad   :  { %v2579_v36 = vrot.slane %v2569_v27, %v5259_v17  ;;  %v2593_v45 = vrot.slane %v2570_v28, %v5259_v17  ;;  %v5294_v12 = vrot.slane %v2571_v29, %v5259_v17 }
 0x4af   :  { %v2608_v46 = vrot.slane %v2579_v36, %v5169_v40  ;;  %v2612_v47 = vrot.slane %v2579_v36, %v5172_v42  ;;  %v2624_v48 = vrot.slane %v2593_v45, %v5169_v40  ;;  %v2628_v49 = vrot.slane %v2593_v45, %v5172_v42 }
 0x4b0   :  { %v2616_v50 = vrot.slane %v2579_v36, %v5175_v43  ;;  %v2620_v51 = vrot.slane %v2579_v36, %v5178_v44  ;;  %v2632_v52 = vrot.slane %v2593_v45, %v5175_v43  ;;  %v2636_v53 = vrot.slane %v2593_v45, %v5178_v44 }
 0x4b1   :  { %v2765_v54 = vadd.f32 %v2608_v46, %v2421_v23  ;;  %v5283_v55 = vadd.f32 %v2612_v47, %v2423_v25  ;;  %v2769_v56 = vadd.f32 %v2624_v48, %v2425_v31  ;;  %v2770_v57 = vadd.f32 %v2628_v49, %v2427_v32  ;;  %v2431_v58 = vpop.f32.mrb[24].mxu0  ;;  %v2504_v59 = vpop.f32.mrb[28].mxu1 }
 0x4b2   :  { %v2767_v60 = vadd.f32 %v2616_v50, %v2494_v24  ;;  %v5285_v61 = vadd.f32 %v2620_v51, %v2496_v26  ;;  %v2771_v62 = vadd.f32 %v2632_v52, %v2498_v1  ;;  %v5287_v63 = vadd.f32 %v2636_v53, %v2500_v35  ;;  %v2433_v0 = vpop.f32.mrb[25].mxu0  ;;  %v2506_v2 = vpop.f32.mrb[29].mxu1 }
 0x4b3   :  { %vm2797_vm11 = vcmp.gt.f32.partialorder %v2765_v54, 0.0  ;;  %v2829_v3 = vmul.f32 0.01, %v2765_v54  ;;  %vm2801_vm12 = vcmp.gt.f32.partialorder %v2769_v56, 0.0  ;;  %v2833_v4 = vmul.f32 0.01, %v2769_v56 }
 0x4b4   :  { %vm2799_vm13 = vcmp.gt.f32.partialorder %v2767_v60, 0.0  ;;  %v2831_v6 = vmul.f32 0.01, %v2767_v60  ;;  %v2435_v7 = vpop.f32.mrb[26].mxu0  ;;  %v2508_v8 = vpop.f32.mrb[30].mxu1  ;;  %vm2803_vm14 = vcmp.gt.f32.partialorder %v2771_v62, 0.0  ;;  %v2601_v33 = vcombine.high %v2579_v36, %v2579_v36 }
 0x4b5   :  { %v5289_v5 = vsel %vm2797_vm11, %v2765_v54, %v2829_v3  ;;  %v5291_v9 = vsel %vm2801_vm12, %v2769_v56, %v2833_v4  ;;  %v2835_v10 = vmul.f32 0.01, %v2771_v62  ;;  %v2437_v11 = vpop.f32.mrb[27].mxu0  ;;  %v2510_v15 = vpop.f32.mrb[31].mxu1  ;;  %v2830_v16 = vmul.f32 0.01, %v5283_v55 }
 0x4b6   :  { %v2893_v13 = vpack.c.bf16 %v5291_v9, %v5289_v5  ;;  %v5298_v14 = vsel %vm2799_vm13, %v2767_v60, %v2831_v6  ;;  %v2603_v19 = vcombine.high %v2593_v45, %v2593_v45  ;;  %vm2798_vm15 = vcmp.gt.f32.partialorder %v5283_v55, 0.0 }
 0x4b7   :  { %v5301_v18 = vsel %vm2803_vm14, %v2771_v62, %v2835_v10  ;;  %vm2802_vm0 = vcmp.gt.f32.partialorder %v2770_v57, 0.0  ;;  %v2834_v37 = vmul.f32 0.01, %v2770_v57  ;;  %v2640_v23 = vrot.slane %v2601_v33, %v5169_v40 }
 0x4b8   :  { %v2895_v20 = vpack.c.bf16 %v5301_v18, %v5298_v14  ;;  %v2648_v24 = vrot.slane %v2601_v33, %v5175_v43  ;;  %v2644_v25 = vrot.slane %v2601_v33, %v5172_v42  ;;  %v2652_v26 = vrot.slane %v2601_v33, %v5178_v44  ;;  %v3499_v14 = vld [vmem:[%s5633_s15] sm:$0x3] }
 0x4b9   :  { %v2441_v21 = vpop.f32.mrb[28].mxu0  ;;  %v2514_v41 = vpop.f32.mrb[32].mxu1  ;;  %v2656_v29 = vrot.slane %v2603_v19, %v5169_v40  ;;  %v2664_v31 = vrot.slane %v2603_v19, %v5175_v43  ;;  %v2660_v1 = vrot.slane %v2603_v19, %v5172_v42  ;;  %v2668_v32 = vrot.slane %v2603_v19, %v5178_v44 }
 0x4ba   :  { %v2443_v27 = vpop.f32.mrb[29].mxu0  ;;  %v2516_v28 = vpop.f32.mrb[33].mxu1  ;;  %v5314_v45 = vadd.f32 %v2640_v23, %v2431_v58  ;;  %v5316_v46 = vadd.f32 %v2648_v24, %v2504_v59  ;;  %v5318_v47 = vadd.f32 %v2644_v25, %v2433_v0  ;;  %v5320_v48 = vadd.f32 %v2652_v26, %v2506_v2  ;;  %v4540_v26 = vld [vmem:[#allocation20 + $0x110] ss:$8 sps:$4 sm:$0xff]  }
 0x4bb   :  { %v2445_v35 = vpop.f32.mrb[30].mxu0  ;;  %v2518_v36 = vpop.f32.mrb[34].mxu1  ;;  %v5324_v51 = vadd.f32 %v2656_v29, %v2435_v7  ;;  %v5326_v52 = vadd.f32 %v2664_v31, %v2508_v8  ;;  %v2778_v53 = vadd.f32 %v2660_v1, %v2437_v11  ;;  %v5328_v54 = vadd.f32 %v2668_v32, %v2510_v15  ;;  %v4542_v15 = vld [vmem:[#allocation20 + $0x114] ss:$8 sps:$4 sm:$0xff]   ;;  %v4545_v29 = vld [vmem:[#allocation20 + $0x124] ss:$8 sps:$4 sm:$0xff]  }
 0x4bc   :  { %v2447_v49 = vpop.f32.mrb[31].mxu0  ;;  %v5322_v50 = vpop.f32.mrb[35].mxu1  ;;  %v5334_v56 = vrot.slane %v2572_v30, %v5259_v17  ;;  %v5337_v58 = vmul.f32 0.01, %v5285_v61  ;;  %v2862_v59 = vsel %vm2798_vm15, %v5283_v55, %v2830_v16  ;;  %v2866_v60 = vsel %vm2802_vm0, %v2770_v57, %v2834_v37  ;;  %v4537_v57 = vld [vmem:[#allocation20 + $0x100] ss:$8 sps:$4 sm:$0xff]  }
 0x4bd   :  { %v5344_v62 = vmul.f32 0.01, %v5287_v63  ;;  %vm2805_vm1 = vcmp.gt.f32.partialorder %v5314_v45, 0.0  ;;  %v2672_v0 = vrot.slane %v5294_v12, %v5169_v40  ;;  %v2680_v17 = vrot.slane %v5294_v12, %v5175_v43 }
 0x4be   :  { %v2837_v34 = vmul.f32 0.01, %v5314_v45  ;;  %v5353_v22 = vmul.f32 0.01, %v5316_v46  ;;  %vm2806_vm2 = vcmp.gt.f32.partialorder %v5318_v47, 0.0  ;;  %vm2810_vm3 = vcmp.gt.f32.partialorder %v2778_v53, 0.0 }
 0x4bf   :  { %v2842_v30 = vmul.f32 0.01, %v2778_v53  ;;  %v2894_v55 = vpack.c.bf16 %v2866_v60, %v2862_v59  ;;  %v5356_v2 = vadd.f32 %v2672_v0, %v2441_v21  ;;  %v5358_v3 = vadd.f32 %v2680_v17, %v2514_v41 }
 0x4c0   :  { %v2676_v7 = vrot.slane %v5294_v12, %v5172_v42  ;;  %v2684_v8 = vrot.slane %v5294_v12, %v5178_v44  ;;  %v2688_v10 = vrot.slane %v5334_v56, %v5169_v40  ;;  %v2696_v11 = vrot.slane %v5334_v56, %v5175_v43 }
 0x4c1   :  { %v5360_v4 = vpop.f32.mrb[32].mxu0  ;;  %v5362_v6 = vpop.f32.mrb[36].mxu1  ;;  %v2838_v19 = vmul.f32 0.01, %v5318_v47  ;;  %v5378_v37 = vmul.f32 0.01, %v5320_v48  ;;  %3337 = vmatprep.mubr.bf16.mxu0 %v2894_v55  ;;  %v2692_v21 = vrot.slane %v5334_v56, %v5172_v42  ;;  %v2874_v9 = vsel %vm2810_vm3, %v2778_v53, %v2842_v30 }
 0x4c2   :  { %v5372_v16 = vpop.f32.mrb[33].mxu0  ;;  %v5374_v33 = vpop.f32.mrb[37].mxu1  ;;  %vm2809_vm4 = vcmp.gt.f32.partialorder %v5324_v51, 0.0  ;;  %3338 = vmatmul.mubr.bf16.vlgmr.msra.gmra.mrb[36].mxu0 %v2893_v13  ;;  %v5386_v41 = vadd.f32 %v2676_v7, %v2443_v27  ;;  %v5388_v23 = vadd.f32 %v2684_v8, %v2516_v28  ;;  %v5390_v24 = vadd.f32 %v2688_v10, %v2445_v35  ;;  %v4543_v7 = vld [vmem:[#allocation20 + $0x120] ss:$8 sps:$4 sm:$0xff]  }
 0x4c3   :  { %v5392_v25 = vadd.f32 %v2696_v11, %v2518_v36  ;;  %v2455_v31 = vpop.f32.mrb[34].mxu0  ;;  %v2528_v1 = vpop.f32.mrb[38].mxu1  ;;  %v2841_v32 = vmul.f32 0.01, %v5324_v51  ;;  %v5396_v59 = vmul.f32 0.01, %v5326_v52  ;;  %3379 = vmatpush1.bf16.msra.mxu0 %v4537_v57  ;;  %v5398_v5 = vadd.f32 %v2692_v21, %v2447_v49 }
 0x4c4   :  { %v2457_v13 = vpop.f32.mrb[35].mxu0  ;;  %v2530_v27 = vpop.f32.mrb[39].mxu1  ;;  %v5402_v28 = vmul.f32 0.01, %v5328_v54  ;;  %v5405_v35 = vmul.f32 0.01, %v5356_v2  ;;  %v2700_v60 = vrot.slane %v5334_v56, %v5178_v44  ;;  %3380 = vmatprep.subr.bf16.mxu0 %v4542_v15  ;;  %v2870_v0 = vsel %vm2806_vm2, %v5318_v47, %v2838_v19 }
 0x4c5   :  { %v5408_v36 = vmul.f32 0.01, %v5358_v3  ;;  %vm2814_vm6 = vcmp.gt.f32.partialorder %v5386_v41, 0.0  ;;  %v2846_v49 = vmul.f32 0.01, %v5386_v41  ;;  %vm2813_vm7 = vcmp.gt.f32.partialorder %v5356_v2, 0.0 }
 0x4c6   :  { %v5415_v53 = vmul.f32 0.01, %v5388_v23  ;;  %vm2817_vm8 = vcmp.gt.f32.partialorder %v5390_v24, 0.0  ;;  %v5423_v17 = vmul.f32 0.01, %v5390_v24  ;;  %v5429_v55 = vadd.f32 %v2700_v60, %v5322_v50 }
 0x4c7   :  { %v5426_v30 = vmul.f32 0.01, %v5392_v25  ;;  %v2898_v57 = vpack.c.bf16 %v2874_v9, %v2870_v0  ;;  %3381 = vmatpush1.bf16.msra.mxu0 %v4540_v26  ;;  %v2602_v8 = vcombine.high %v5294_v12, %v5294_v12  ;;  %v2869_v47 = vsel %vm2805_vm1, %v5314_v45, %v2837_v34  ;;  %v4548_v15 = vld [vmem:[#allocation20 + $0x134] ss:$8 sps:$4 sm:$0xff]  }
 0x4c8   :  { %v2873_v10 = vsel %vm2809_vm4, %v5324_v51, %v2841_v32  ;;  %v2604_v11 = vcombine.high %v5334_v56, %v5334_v56  ;;  %vm2800_vm9 = vcmp.gt.f32.partialorder %v5285_v61, 0.0  ;;  %vm2804_vm10 = vcmp.gt.f32.partialorder %v5287_v63, 0.0  ;;  %3382 = vmatprep.subr.bf16.mxu0 %v4545_v29 }
 0x4c9   :  { %vm2818_vm11 = vcmp.gt.f32.partialorder %v5398_v5, 0.0  ;;  %v2850_v12 = vmul.f32 0.01, %v5398_v5  ;;  %v5446_v50 = vmul.f32 0.01, %v5429_v55  ;;  %3347 = vmatprep.mubr.bf16.mxu0 %v2898_v57  ;;  %v2897_v45 = vpack.c.bf16 %v2873_v10, %v2869_v47 }
 0x4ca   :  { %vm2808_vm12 = vcmp.gt.f32.partialorder %v5320_v48, 0.0  ;;  %v2704_v51 = vrot.slane %v2602_v8, %v5169_v40  ;;  %v2712_v56 = vrot.slane %v2602_v8, %v5175_v43  ;;  %v2708_v34 = vrot.slane %v2602_v8, %v5172_v42 }
 0x4cb   :  { %v2716_v19 = vrot.slane %v2602_v8, %v5178_v44  ;;  %vm2807_vm13 = vcmp.gt.f32.partialorder %v5316_v46, 0.0  ;;  %vm2812_vm15 = vcmp.gt.f32.partialorder %v5328_v54, 0.0  ;;  %3348 = vmatmul.mubr.bf16.gmra.mrb[40].mxu0 %v2897_v45  ;;  %v2720_v21 = vrot.slane %v2604_v11, %v5169_v40 }
 0x4cc   :  { %v2728_v26 = vrot.slane %v2604_v11, %v5175_v43  ;;  %v2724_v29 = vrot.slane %v2604_v11, %v5172_v42  ;;  %v2732_v32 = vrot.slane %v2604_v11, %v5178_v44  ;;  %v2789_v9 = vadd.f32 %v2704_v51, %v5360_v4  ;;  %3383 = vmatpush1.bf16.msra.mxu0 %v4543_v7  ;;  %v4546_v43 = vld [vmem:[#allocation20 + $0x130] ss:$8 sps:$4 sm:$0xff]   ;;  %v4551_v11 = vld [vmem:[#allocation20 + $0x144] ss:$8 sps:$4 sm:$0xff]  }
 0x4cd   :  { %v5465_v60 = vadd.f32 %v2712_v56, %v5362_v6  ;;  %v2790_v0 = vadd.f32 %v2708_v34, %v5372_v16  ;;  %v5469_v57 = vadd.f32 %v2716_v19, %v5374_v33  ;;  %v2793_v8 = vadd.f32 %v2720_v21, %v2455_v31  ;;  %3384 = vmatprep.subr.bf16.mxu0 %v4548_v15  ;;  %v4549_v33 = vld [vmem:[#allocation20 + $0x140] ss:$8 sps:$4 sm:$0xff]  }
 0x4ce   :  { %v5472_v44 = vadd.f32 %v2728_v26, %v2528_v1  ;;  %v2794_v47 = vadd.f32 %v2724_v29, %v2457_v13  ;;  %v2796_v10 = vadd.f32 %v2732_v32, %v2530_v27  ;;  %vm2821_vm4 = vcmp.gt.f32.partialorder %v2789_v9, 0.0  ;;  %v4554_v1 = vld [vmem:[#allocation20 + $0x154] ss:$8 sps:$4 sm:$0xff]  }
 0x4cf   :  { %v2853_v4 = vmul.f32 0.01, %v2789_v9  ;;  %v2855_v6 = vmul.f32 0.01, %v5465_v60  ;;  %v2878_v16 = vsel %vm2814_vm6, %v5386_v41, %v2846_v49  ;;  %vm2823_vm5 = vcmp.gt.f32.partialorder %v5465_v60, 0.0 }
 0x4d0   :  { %vm2822_vm1 = vcmp.gt.f32.partialorder %v2790_v0, 0.0  ;;  %v2854_v7 = vmul.f32 0.01, %v2790_v0  ;;  %v2856_v31 = vmul.f32 0.01, %v5469_v57  ;;  %vm2824_vm3 = vcmp.gt.f32.partialorder %v5469_v57, 0.0  ;;  %3385 = vmatpush1.bf16.msra.mxu0 %v4546_v43 }
 0x4d1   :  { %vm2825_vm2 = vcmp.gt.f32.partialorder %v2793_v8, 0.0  ;;  %v2857_v13 = vmul.f32 0.01, %v2793_v8  ;;  %v2859_v27 = vmul.f32 0.01, %v5472_v44  ;;  %vm2827_vm0 = vcmp.gt.f32.partialorder %v5472_v44, 0.0  ;;  %3386 = vmatprep.subr.bf16.mxu0 %v4551_v11 }
 0x4d2   :  { %vm2826_vm14 = vcmp.gt.f32.partialorder %v2794_v47, 0.0  ;;  %v2858_v15 = vmul.f32 0.01, %v2794_v47  ;;  %v2860_v41 = vmul.f32 0.01, %v2796_v10  ;;  %v2882_v49 = vsel %vm2818_vm11, %v5398_v5, %v2850_v12 }
 0x4d3   :  { %v2877_v45 = vsel %vm2813_vm7, %v5356_v2, %v5405_v35  ;;  %v2881_v51 = vsel %vm2817_vm8, %v5390_v24, %v5423_v17  ;;  %v2886_v56 = vsel %vm2822_vm1, %v2790_v0, %v2854_v7  ;;  %v2902_v34 = vpack.c.bf16 %v2882_v49, %v2878_v16  ;;  %v4552_v5 = vld [vmem:[#allocation20 + $0x150] ss:$8 sps:$4 sm:$0xff]   ;;  %v4557_v35 = vld [vmem:[#allocation20 + $0x164] ss:$8 sps:$4 sm:$0xff]   ;;  %v4566_v43 = vld [vmem:[#allocation20 + $0x194] ss:$8 sps:$4 sm:$0xff]  }
 0x4d4   :  { %v2901_v19 = vpack.c.bf16 %v2881_v51, %v2877_v45  ;;  %v2890_v21 = vsel %vm2826_vm14, %v2794_v47, %v2858_v15  ;;  %v2885_v26 = vsel %vm2821_vm4, %v2789_v9, %v2853_v4  ;;  %3387 = vmatpush1.bf16.msra.mxu0 %v4549_v33  ;;  %v2889_v12 = vsel %vm2825_vm2, %v2793_v8, %v2857_v13  ;;  %v4564_v8 = vld [vmem:[#allocation20 + $0x190] ss:$8 sps:$4 sm:$0xff]   ;;  %v4569_v47 = vld [vmem:[#allocation20 + $0x1a4] ss:$8 sps:$4 sm:$0xff]   ;;  %v4573_v4 = vld [vmem:[#allocation20 + $0x1c0] ss:$8 sps:$4 sm:$0xff]  }
 0x4d5   :  { %v2906_v29 = vpack.c.bf16 %v2890_v21, %v2886_v56  ;;  %v2864_v2 = vsel %vm2800_vm9, %v5285_v61, %v5337_v58  ;;  %v2868_v24 = vsel %vm2804_vm10, %v5287_v63, %v5344_v62  ;;  %vm2828_vm6 = vcmp.gt.f32.partialorder %v2796_v10, 0.0  ;;  %3357 = vmatprep.mubr.bf16.mxu0 %v2902_v34  ;;  %3388 = vmatprep.subr.bf16.mxu0 %v4554_v1  ;;  %v4575_v11 = vld [vmem:[#allocation20 + $0x1c4] ss:$8 sps:$4 sm:$0xff]   ;;  %v4576_v16 = vld [vmem:[#allocation20 + $0x1d0] ss:$8 sps:$4 sm:$0xff]  }
 0x4d6   :  { %v2905_v17 = vpack.c.bf16 %v2889_v12, %v2885_v26  ;;  %v2896_v32 = vpack.c.bf16 %v2868_v24, %v2864_v2  ;;  %v5509_v9 = vsel %vm2808_vm12, %v5320_v48, %v5378_v37  ;;  %3358 = vmatmul.mubr.bf16.gmra.mrb[44].mxu0 %v2901_v19  ;;  %v2876_v61 = vsel %vm2812_vm15, %v5328_v54, %v5402_v28  ;;  %v4581_v33 = vld [vmem:[#allocation20 + $0x1e4] ss:$8 sps:$4 sm:$0xff]   ;;  %v4579_v7 = vld [vmem:[#allocation20 + $0x1e0] ss:$8 sps:$4 sm:$0xff]   ;;  %v4582_v1 = vld [vmem:[#allocation20 + $0x1f0] ss:$8 sps:$4 sm:$0xff]  }
 0x4d7   :  { %v2871_v63 = vsel %vm2807_vm13, %v5316_v46, %v5353_v22  ;;  %vm5645_vm7 = vcmp.gt.f32.partialorder %v5326_v52, 0.0  ;;  %vm5646_vm8 = vcmp.gt.f32.partialorder %v5388_v23, 0.0  ;;  %3367 = vmatprep.mubr.bf16.mxu0 %v2906_v29  ;;  %v2900_v62 = vpack.c.bf16 %v2876_v61, %v5509_v9  ;;  %v2973_v13 = vld [vmem:[%s5632_s14] sm:$0x3]  ;;  %s4914_s14 = smov [#allocation21]  }
 0x4d8   :  { %v2875_v58 = vsel %vm5645_vm7, %v5326_v52, %v5396_v59  ;;  %v2880_v48 = vsel %vm5646_vm8, %v5388_v23, %v5415_v53  ;;  %vm5647_vm9 = vcmp.gt.f32.partialorder %v5429_v55, 0.0  ;;  %vm5648_vm10 = vcmp.gt.f32.partialorder %v5358_v3, 0.0  ;;  %3389 = vmatpush1.bf16.msra.mxu0 %v4552_v5  ;;  %v4555_v52 = vld [vmem:[#allocation20 + $0x160] ss:$8 sps:$4 sm:$0xff]   ;;  %v4560_v53 = vld [vmem:[#allocation20 + $0x174] ss:$8 sps:$4 sm:$0xff]  }
 0x4d9   :  { %v2899_v37 = vpack.c.bf16 %v2875_v58, %v2871_v63  ;;  %v2884_v54 = vsel %vm5647_vm9, %v5429_v55, %v5446_v50  ;;  %v2879_v46 = vsel %vm5648_vm10, %v5358_v3, %v5408_v36  ;;  %vm5649_vm11 = vcmp.gt.f32.partialorder %v5392_v25, 0.0  ;;  %3390 = vmatprep.subr.bf16.mxu0 %v4557_v35  ;;  %s3681_s15 = sshll.u32 %s4914_s14, 4  ;;  %s3682_s15 = int_to_ptr.vmem [resolvable:$true] %s3681_s15 }
 0x4da   :  { %v2904_v22 = vpack.c.bf16 %v2884_v54, %v2880_v48  ;;  %v2883_v23 = vsel %vm5649_vm11, %v5392_v25, %v5426_v30  ;;  %v2888_v59 = vsel %vm2824_vm3, %v5469_v57, %v2856_v31  ;;  %v2892_v28 = vsel %vm2828_vm6, %v2796_v10, %v2860_v41  ;;  %v4558_v25 = vld [vmem:[#allocation20 + $0x170] ss:$8 sps:$4 sm:$0xff]   ;;  %v4563_v30 = vld [vmem:[#allocation20 + $0x184] ss:$8 sps:$4 sm:$0xff]   ;;  %v4561_v57 = vld [vmem:[#allocation20 + $0x180] ss:$8 sps:$4 sm:$0xff]   ;;  %p4864_p5 = scmp.lt.s32.totalorder %s3682_s15, %s3682_s15 }
 0x4db   :  { %v2903_v55 = vpack.c.bf16 %v2883_v23, %v2879_v46  ;;  %v2908_v50 = vpack.c.bf16 %v2892_v28, %v2888_v59  ;;  %v2887_v3 = vsel %vm2823_vm5, %v5465_v60, %v2855_v6  ;;  %v2891_v36 = vsel %vm2827_vm0, %v5472_v44, %v2859_v27  ;;  %v4567_v60 = vld [vmem:[#allocation20 + $0x1a0] ss:$8 sps:$4 sm:$0xff]   ;;  %v4572_v10 = vld [vmem:[#allocation20 + $0x1b4] ss:$8 sps:$4 sm:$0xff]   ;;  %v4570_v44 = vld [vmem:[#allocation20 + $0x1b0] ss:$8 sps:$4 sm:$0xff]  }
 0x4dc   :  { %v2907_v0 = vpack.c.bf16 %v2891_v36, %v2887_v3  ;;  %3391 = vmatpush1.bf16.msra.mxu0 %v4555_v52  ;;  %v4578_v6 = vld [vmem:[#allocation20 + $0x1d4] ss:$8 sps:$4 sm:$0xff]   ;;  %v5557_v27 = vrot.slane %v2973_v13, %v5169_v40  ;;  %v5560_v15 = vrot.slane %v2973_v13, %v5172_v42  ;;  %v5568_v51 = vrot.slane %v3499_v14, %v5169_v40  ;;  %s4859_s24 = scalar_lea.vmem %s3682_s15, 128 }
 0x4dd   :  { %3392 = vmatprep.subr.bf16.mxu0 %v4560_v53  ;;  %v4584_v31 = vld [vmem:[#allocation20 + $0x1f4] ss:$8 sps:$4 sm:$0xff]   ;;  %v5572_v21 = vrot.slane %v3499_v14, %v5172_v42  ;;  %p4860_p4 = scmp.ne.s32.totalorder %s3682_s15, %s4859_s24  ;;  %p4865_p6 = scmp.lt.s32.totalorder %s4859_s24, %s4859_s24 }
 0x4de   :  { %3368 = vmatmul.mubr.bf16.gmra.mrb[48].mxu0 %v2905_v17 }
 0x4df   :  { %3410 = vmatprep.mubr.bf16.mxu0 %v2896_v32  ;;  %p4866_p7 = por %p4865_p6, %p4864_p5 }
 0x4e0   :  { %3393 = vmatpush1.bf16.msra.mxu0 %v4558_v25 }
 0x4e1   :  { %3394 = vmatprep.subr.bf16.mxu0 %v4563_v30  ;;  %p4867_p8 = pnand %p4866_p7, %p4860_p4 }
 0x4e4   :  { %3395 = vmatpush1.bf16.msra.mxu0 %v4561_v57 }
 0x4e5   :  { %3396 = vmatprep.subr.bf16.mxu0 %v4566_v43 }
 0x4e8   :  { %3397 = vmatpush1.bf16.msra.mxu0 %v4564_v8 }
 0x4e9   :  { %3398 = vmatprep.subr.bf16.mxu0 %v4569_v47 }
 0x4ec   :  { %3399 = vmatpush1.bf16.msra.mxu0 %v4567_v60 }
 0x4ed   :  { %3400 = vmatprep.subr.bf16.mxu0 %v4572_v10 }
 0x4f0   :  { %3401 = vmatpush1.bf16.msra.mxu0 %v4570_v44 }
 0x4f1   :  { %3402 = vmatprep.subr.bf16.mxu0 %v4575_v11 }
 0x4f4   :  { %3403 = vmatpush1.bf16.msra.mxu0 %v4573_v4 }
 0x4f5   :  { %3404 = vmatprep.subr.bf16.mxu0 %v4578_v6 }
 0x4f8   :  { %3405 = vmatpush1.bf16.msra.mxu0 %v4576_v16 }
 0x4f9   :  { %3406 = vmatprep.subr.bf16.mxu0 %v4581_v33 }
 0x4fc   :  { %3407 = vmatpush1.bf16.msra.mxu0 %v4579_v7 }
 0x4fd   :  { %3408 = vmatprep.subr.bf16.mxu0 %v4584_v31 }
 0x500   :  { %3409 = vmatpush1.bf16.msra.mxu0 %v4582_v1 }
 0x503   :  { %3411 = vmatmul.mubr.bf16.vlgmr.msra.gmra.mrb[36].mxu0 %v2895_v20 }
 0x504   :  { %3420 = vmatprep.mubr.bf16.mxu0 %v2900_v62 }
 0x50b   :  { %3421 = vmatmul.mubr.bf16.gmra.mrb[40].mxu0 %v2899_v37 }
 0x50c   :  { %3430 = vmatprep.mubr.bf16.mxu0 %v2904_v22 }
 0x513   :  { %3431 = vmatmul.mubr.bf16.gmra.mrb[44].mxu0 %v2903_v55 }
 0x514   :  { %3440 = vmatprep.mubr.bf16.mxu0 %v2908_v50 }
 0x51b   :  { %3441 = vmatmul.mubr.bf16.gmra.mrb[48].mxu0 %v2907_v0 }
 0x5d6   :  { %v3412_v18 = vpop.f32.mrb[36].mxu0 }
 0x5d7   :  { %v4080_v20 = vadd.f32 %v3412_v18, %v5557_v27  ;;  %v3414_v41 = vpop.f32.mrb[37].mxu0 }
 0x5d8   :  { %v4081_v49 = vadd.f32 %v3414_v41, %v5560_v15  ;;  %v3416_v45 = vpop.f32.mrb[38].mxu0 }
 0x5d9   :  { %vm3451_vm5 = vcmp.gt.f32.partialorder %v4080_v20, 0.0  ;;  %v3467_v56 = vmul.f32 0.01, %v4080_v20  ;;  %v4082_v34 = vadd.f32 %v3416_v45, %v5557_v27  ;;  %v3418_v19 = vpop.f32.mrb[39].mxu0 }
 0x5da   :  { %vm3452_vm12 = vcmp.gt.f32.partialorder %v4081_v49, 0.0  ;;  %v3468_v26 = vmul.f32 0.01, %v4081_v49  ;;  %v4083_v29 = vadd.f32 %v3418_v19, %v5560_v15 }
 0x5db   :  { %vm3453_vm13 = vcmp.gt.f32.partialorder %v4082_v34, 0.0  ;;  %v3469_v5 = vmul.f32 0.01, %v4082_v34  ;;  %v3483_v12 = vsel %vm3451_vm5, %v4080_v20, %v3467_v56  ;;  %vm3659_vm5 = vcmask 1041409  }
 0x5dc   :  { %vm3454_vm14 = vcmp.gt.f32.partialorder %v4083_v29, 0.0  ;;  %v3470_v2 = vmul.f32 0.01, %v4083_v29  ;;  %v3484_v24 = vsel %vm3452_vm12, %v4081_v49, %v3468_v26  ;;  %v3511_v40 = vmul.f32 %v5568_v51, %v3483_v12 }
 0x5dd   :  { %v3512_v35 = vmul.f32 %v5572_v21, %v3484_v24  ;;  %v3485_v17 = vsel %vm3453_vm13, %v4082_v34, %v3469_v5  ;;  %vm3661_vm12 = vcmask 1042434   ;;  %vm3663_vm13 = vcmask 1043459  }
 0x5de   :  { %v3422_v32 = vpop.f32.mrb[40].mxu0  ;;  %v3486_v9 = vsel %vm3454_vm14, %v4083_v29, %v3470_v2  ;;  %v3513_v42 = vmul.f32 %v5568_v51, %v3485_v17  ;;  %vm3665_vm14 = vcmask 1044484  }
 0x5df   :  { %v4084_v61 = vadd.f32 %v3422_v32, %v5557_v27  ;;  %v3424_v63 = vpop.f32.mrb[41].mxu0  ;;  %v3527_v58 = vadd.f32 %v3512_v35, %v3511_v40  ;;  %v3514_v48 = vmul.f32 %v5572_v21, %v3486_v9 }
 0x5e0   :  { %v4085_v62 = vadd.f32 %v3424_v63, %v5560_v15  ;;  %v3426_v37 = vpop.f32.mrb[42].mxu0 }
 0x5e1   :  { %vm3455_vm15 = vcmp.gt.f32.partialorder %v4084_v61, 0.0  ;;  %v3471_v54 = vmul.f32 0.01, %v4084_v61  ;;  %v4086_v46 = vadd.f32 %v3426_v37, %v5557_v27  ;;  %v3428_v52 = vpop.f32.mrb[43].mxu0  ;;  %3528 = vadd.xlane.f32.xlu0 %v3527_v58  ;;  %v3530_v22 = vadd.f32 %v3514_v48, %v3513_v42 }
 0x5e2   :  { %vm3456_vm0 = vcmp.gt.f32.partialorder %v4085_v62, 0.0  ;;  %v3472_v23 = vmul.f32 0.01, %v4085_v62  ;;  %v4087_v59 = vadd.f32 %v3428_v52, %v5560_v15  ;;  %v4021_v52 = vld [vmem:[#allocation2] ss:$0 sm:$0xff] }
 0x5e3   :  { %vm3457_vm1 = vcmp.gt.f32.partialorder %v4086_v46, 0.0  ;;  %v3473_v28 = vmul.f32 0.01, %v4086_v46  ;;  %v3487_v53 = vsel %vm3455_vm15, %v4084_v61, %v3471_v54  ;;  %vm3667_vm15 = vcmask 1045509  }
 0x5e4   :  { %vm3458_vm2 = vcmp.gt.f32.partialorder %v4087_v59, 0.0  ;;  %v3474_v55 = vmul.f32 0.01, %v4087_v59  ;;  %v3488_v50 = vsel %vm3456_vm0, %v4085_v62, %v3472_v23  ;;  %v3515_v3 = vmul.f32 %v5568_v51, %v3487_v53 }
 0x5e5   :  { %3531 = vadd.xlane.f32.xlu0 %v3530_v22  ;;  %v3516_v36 = vmul.f32 %v5572_v21, %v3488_v50  ;;  %v3489_v0 = vsel %vm3457_vm1, %v4086_v46, %v3473_v28  ;;  %vm3669_vm0 = vcmask 1046534   ;;  %vm3671_vm1 = vcmask 1047559  }
 0x5e6   :  { %v3432_v25 = vpop.f32.mrb[44].mxu0  ;;  %v3490_v30 = vsel %vm3458_vm2, %v4087_v59, %v3474_v55  ;;  %v3517_v57 = vmul.f32 %v5568_v51, %v3489_v0  ;;  %vm5650_vm2 = vcmask 64512  }
 0x5e7   :  { %v4088_v43 = vadd.f32 %v3432_v25, %v5557_v27  ;;  %v3434_v8 = vpop.f32.mrb[45].mxu0  ;;  %v3533_v47 = vadd.f32 %v3516_v36, %v3515_v3  ;;  %v3518_v60 = vmul.f32 %v5572_v21, %v3490_v30 }
 0x5e8   :  { %v4089_v10 = vadd.f32 %v3434_v8, %v5560_v15  ;;  %v3436_v44 = vpop.f32.mrb[46].mxu0 }
 0x5e9   :  { %vm3459_vm3 = vcmp.gt.f32.partialorder %v4088_v43, 0.0  ;;  %v3475_v11 = vmul.f32 0.01, %v4088_v43  ;;  %v4090_v4 = vadd.f32 %v3436_v44, %v5557_v27  ;;  %v3438_v6 = vpop.f32.mrb[47].mxu0  ;;  %3534 = vadd.xlane.f32.xlu1 %v3533_v47  ;;  %v3536_v16 = vadd.f32 %v3518_v60, %v3517_v57 }
 0x5ea   :  { %vm3460_vm4 = vcmp.gt.f32.partialorder %v4089_v10, 0.0  ;;  %v3476_v33 = vmul.f32 0.01, %v4089_v10  ;;  %v4091_v7 = vadd.f32 %v3438_v6, %v5560_v15 }
 0x5eb   :  { %vm3461_vm6 = vcmp.gt.f32.partialorder %v4090_v4, 0.0  ;;  %v3477_v31 = vmul.f32 0.01, %v4090_v4  ;;  %v3491_v1 = vsel %vm3459_vm3, %v4088_v43, %v3475_v11 }
 0x5ec   :  { %vm3462_vm7 = vcmp.gt.f32.partialorder %v4091_v7, 0.0  ;;  %v3478_v13 = vmul.f32 0.01, %v4091_v7  ;;  %v3492_v14 = vsel %vm3460_vm4, %v4089_v10, %v3476_v33  ;;  %v3519_v18 = vmul.f32 %v5568_v51, %v3491_v1 }
 0x5ed   :  { %3537 = vadd.xlane.f32.xlu1 %v3536_v16  ;;  %v3520_v20 = vmul.f32 %v5572_v21, %v3492_v14  ;;  %v3493_v41 = vsel %vm3461_vm6, %v4090_v4, %v3477_v31 }
 0x5ee   :  { %v3442_v49 = vpop.f32.mrb[48].mxu0  ;;  %v3494_v45 = vsel %vm3462_vm7, %v4091_v7, %v3478_v13  ;;  %v3521_v56 = vmul.f32 %v5568_v51, %v3493_v41 }
 0x5ef   :  { %v4092_v34 = vadd.f32 %v3442_v49, %v5557_v27  ;;  %v3444_v19 = vpop.f32.mrb[49].mxu0  ;;  %v3539_v26 = vadd.f32 %v3520_v20, %v3519_v18  ;;  %v3522_v29 = vmul.f32 %v5572_v21, %v3494_v45 }
 0x5f0   :  { %v4093_v5 = vadd.f32 %v3444_v19, %v5560_v15  ;;  %v3446_v12 = vpop.f32.mrb[50].mxu0  ;;  %v3626_v19 = vand.u32 127, %v235_v38 }
 0x5f1   :  { %vm3463_vm8 = vcmp.gt.f32.partialorder %v4092_v34, 0.0  ;;  %v3479_v2 = vmul.f32 0.01, %v4092_v34  ;;  %v4094_v24 = vadd.f32 %v3446_v12, %v5557_v27  ;;  %v3448_v40 = vpop.f32.mrb[51].mxu0  ;;  %3540 = vadd.xlane.f32.xlu0 %v3539_v26  ;;  %v3542_v35 = vadd.f32 %v3522_v29, %v3521_v56 }
 0x5f2   :  { %vm3464_vm9 = vcmp.gt.f32.partialorder %v4093_v5, 0.0  ;;  %v3480_v17 = vmul.f32 0.01, %v4093_v5  ;;  %v4095_v32 = vadd.f32 %v3448_v40, %v5560_v15  ;;  %v3629_v12 = vsub.s32 %v3626_v19, %v5166_v39 }
 0x5f3   :  { %vm3465_vm10 = vcmp.gt.f32.partialorder %v4094_v24, 0.0  ;;  %v3481_v9 = vmul.f32 0.01, %v4094_v24  ;;  %3543 = vadd.xlane.f32.xlu1 %v3542_v35  ;;  %v3495_v42 = vsel %vm3463_vm8, %v4092_v34, %v3479_v2 }
 0x5f4   :  { %vm3466_vm11 = vcmp.gt.f32.partialorder %v4095_v32, 0.0  ;;  %v3482_v61 = vmul.f32 0.01, %v4095_v32  ;;  %v3496_v63 = vsel %vm3464_vm9, %v4093_v5, %v3480_v17  ;;  %v3523_v58 = vmul.f32 %v5568_v51, %v3495_v42 }
 0x5f5   :  { %v3524_v48 = vmul.f32 %v5572_v21, %v3496_v63  ;;  %v3497_v62 = vsel %vm3465_vm10, %v4094_v24, %v3481_v9 }
 0x5f6   :  { %v3498_v27 = vsel %vm3466_vm11, %v4095_v32, %v3482_v61  ;;  %v3525_v37 = vmul.f32 %v5568_v51, %v3497_v62 }
 0x5f7   :  { %v3545_v54 = vadd.f32 %v3524_v48, %v3523_v58  ;;  %v3526_v46 = vmul.f32 %v5572_v21, %v3498_v27 }
 0x5f9   :  { %3546 = vadd.xlane.f32.xlu0 %v3545_v54  ;;  %v3548_v15 = vadd.f32 %v3526_v46, %v3525_v37 }
 0x5fb   :  { %3549 = vadd.xlane.f32.xlu1 %v3548_v15 }
 0x60f   :  { %3558 = vperm.xlu0 %4136, %v4021_v52  }
 0x66e   :  { %v3529_v22 = vpop.xlane.xlu0 %3528 }
 0x672   :  { %v3532_v23 = vpop.xlane.xlu0 %3531 }
 0x676   :  { %v3535_v59 = vpop.xlane.xlu1 %3534 }
 0x67a   :  { %v3538_v53 = vpop.xlane.xlu1 %3537 }
 0x67e   :  { %v3541_v28 = vpop.xlane.xlu0 %3540 }
 0x680   :  { %v3544_v50 = vpop.xlane.xlu1 %3543 }
 0x686   :  { %v3547_v55 = vpop.xlane.xlu0 %3546 }
 0x688   :  { %v3550_v21 = vpop.xlane.xlu1 %3549 }
 0x68e   :  { %v3559_v3 = vpop.permute.xlu0 %3558 }
 0x68f   :  { %v3561_v36 = vadd.f32 %v3559_v3, %v3529_v22  ;;  %v3562_v0 = vadd.f32 %v3559_v3, %v3532_v23  ;;  %v3563_v25 = vadd.f32 %v3559_v3, %v3535_v59  ;;  %v3564_v51 = vadd.f32 %v3559_v3, %v3538_v53 }
 0x690   :  { %v3565_v30 = vadd.f32 %v3559_v3, %v3541_v28  ;;  %v3566_v57 = vadd.f32 %v3559_v3, %v3544_v50  ;;  %v3567_v43 = vadd.f32 %v3559_v3, %v3547_v55  ;;  %v3568_v10 = vadd.f32 %v3559_v3, %v3550_v21 }
 0x691   :  { %v4022_v8 = vmul.f32 -1.442695, %v3561_v36  ;;  %v4023_v47 = vmul.f32 -1.442695, %v3562_v0  ;;  %v4024_v60 = vmul.f32 -1.442695, %v3563_v25 }
 0x692   :  { %v4025_v44 = vmul.f32 -1.442695, %v3564_v51  ;;  %v4026_v11 = vmul.f32 -1.442695, %v3565_v30  ;;  %v4027_v4 = vmul.f32 -1.442695, %v3566_v57 }
 0x693   :  { %4585 = vpow2.f32 %v4022_v8  ;;  %v4028_v6 = vmul.f32 -1.442695, %v3567_v43  ;;  %v4029_v16 = vmul.f32 -1.442695, %v3568_v10 }
 0x694   :  { %4587 = vpow2.f32 %v4023_v47 }
 0x695   :  { %4589 = vpow2.f32 %v4024_v60 }
 0x696   :  { %4591 = vpow2.f32 %v4025_v44 }
 0x697   :  { %4593 = vpow2.f32 %v4026_v11 }
 0x698   :  { %4595 = vpow2.f32 %v4027_v4 }
 0x699   :  { %4597 = vpow2.f32 %v4028_v6 }
 0x69a   :  { %4599 = vpow2.f32 %v4029_v16 }
 0x69d   :  { %v4586_v33 = vpop.eup %4585 }
 0x69e   :  { %v4588_v7 = vpop.eup %4587  ;;  %v3593_v31 = vadd.f32 1.0, %v4586_v33 }
 0x69f   :  { %v4590_v1 = vpop.eup %4589  ;;  %v3594_v13 = vadd.f32 1.0, %v4588_v7 }
 0x6a0   :  { %v4592_v14 = vpop.eup %4591  ;;  %v3595_v18 = vadd.f32 1.0, %v4590_v1  ;;  %4601 = vrcp.f32 %v3593_v31 }
 0x6a1   :  { %v4594_v20 = vpop.eup %4593  ;;  %v3596_v41 = vadd.f32 1.0, %v4592_v14  ;;  %4603 = vrcp.f32 %v3594_v13 }
 0x6a2   :  { %v4596_v49 = vpop.eup %4595  ;;  %v3597_v45 = vadd.f32 1.0, %v4594_v20  ;;  %4605 = vrcp.f32 %v3595_v18 }
 0x6a3   :  { %v4598_v56 = vpop.eup %4597  ;;  %v3598_v34 = vadd.f32 1.0, %v4596_v49  ;;  %4607 = vrcp.f32 %v3596_v41 }
 0x6a4   :  { %v4600_v26 = vpop.eup %4599  ;;  %v3599_v29 = vadd.f32 1.0, %v4598_v56  ;;  %4609 = vrcp.f32 %v3597_v45 }
 0x6a5   :  { %v3600_v5 = vadd.f32 1.0, %v4600_v26  ;;  %4611 = vrcp.f32 %v3598_v34 }
 0x6a6   :  { %4613 = vrcp.f32 %v3599_v29 }
 0x6a7   :  { %4615 = vrcp.f32 %v3600_v5 }
 0x6aa   :  { %v4602_v2 = vpop.eup %4601 }
 0x6ab   :  { %v4604_v24 = vpop.eup %4603  ;;  %v3630_v40 = vrot.slane %v4602_v2, %v3629_v12 }
 0x6ac   :  { %v4606_v35 = vpop.eup %4605  ;;  %v3634_v17 = vrot.slane %v4604_v24, %v3629_v12 }
 0x6ad   :  { %v4608_v32 = vpop.eup %4607  ;;  %v3638_v9 = vrot.slane %v4606_v35, %v3629_v12 }
 0x6ae   :  { %v4610_v38 = vpop.eup %4609  ;;  %v3642_v42 = vrot.slane %v4608_v32, %v3629_v12  ;;  %v3660_v61 = vsel %vm3659_vm5, %v3634_v17, %v3630_v40 }
 0x6af   :  { %v4612_v63 = vpop.eup %4611  ;;  %v3646_v58 = vrot.slane %v4610_v38, %v3629_v12  ;;  %v3662_v48 = vsel %vm3661_vm12, %v3638_v9, %v3660_v61 }
 0x6b0   :  { %v4614_v62 = vpop.eup %4613  ;;  %v3650_v39 = vrot.slane %v4612_v63, %v3629_v12  ;;  %v3664_v27 = vsel %vm3663_vm13, %v3642_v42, %v3662_v48 }
 0x6b1   :  { %v4616_v37 = vpop.eup %4615  ;;  %v3654_v54 = vrot.slane %v4614_v62, %v3629_v12  ;;  %v3666_v46 = vsel %vm3665_vm14, %v3646_v58, %v3664_v27 }
 0x6b2   :  { %v3658_v15 = vrot.slane %v4616_v37, %v3629_v12  ;;  %v3668_v52 = vsel %vm3667_vm15, %v3650_v39, %v3666_v46 }
 0x6b3   :  { %v3670_v22 = vsel %vm3669_vm0, %v3654_v54, %v3668_v52 }
 0x6b4   :  { %v3672_v23 = vsel %vm3671_vm1, %v3658_v15, %v3670_v22 }
 0x6b5   :  { %3674 = vst.msk [vmem:[#allocation21] sm:$0xff] %vm5650_vm2, %v3672_v23 }
 0x6b6   :  { %4870 = shalt.err (!%p4867_p8)
}
 0x6b7   :  { %s4871_s5 = scalar_lea.hbm %s5635_s17, 128 }
 0x6b8   :  { %p4872_p9 = scmp.ne.s32.totalorder %s5635_s17, %s4871_s5  ;;  %p4875_p10 = scmp.lt.u32.totalorder %s4871_s5, %s5635_s17 }
 0x6ba   :  { %p4877_p11 = pnand %p4875_p10, %p4872_p9 }
 0x6bc   :  { %4880 = shalt.err (!%p4877_p11)
}
 0x6bd   :  { %3684 = dma.vmem_to_hbm [thread:$0]  %s3682_s15, 128, %s5635_s17, [#allocation5]  }
 0x6be   :  { %4893 = dma.done.wait [#allocation5], 128  }
 0x6bf   :  { %4894 = vsyncadd [#allocation5], 4294967168 }
 0x6c0   :  { %3688 = vsyncpa [#allocation4], 1 }
 0x6c1   :  { %3689 = vsyncpa [#allocation7], 1 }
 0x6c2   :  { %3690 = vsyncpa [#allocation10], 1 }
 0x6c3   :  { %3691 = vsyncpa [#allocation13], 1 }
 0x6c4   :  { %3692 = vsyncpa [#allocation16], 1 }
 0x6c5   :  { %3693 = vsyncpa [#allocation19], 1 }
 0x6c6   :  { %3694 = vsyncpa [#allocation5], 1 }

</bundles_post_ra>
